<compile_context>
chip_gen: v7x
topology: tpu7x:2x2x1
jax: 0.10.0
libtpu: 0.0.40
codegen_flags: <defaults>
</compile_context>

<pallas_src>
import math
import functools

import jax
import jax.numpy as jnp
from jax.experimental import pallas as pl
from jax.experimental.pallas import tpu as pltpu


# ----------------------------------------------------------------------------
# Helpers
# ----------------------------------------------------------------------------

def _row_tile(m):
    """Largest row tile (multiple of 8) dividing m that leaves >=2 grid steps."""
    for t in (512, 256, 128, 64, 32, 16, 8):
        if m % t == 0 and m // t >= 2:
            return t
    return m


_PARALLEL_1D = pltpu.CompilerParams(dimension_semantics=("parallel",))


# ----------------------------------------------------------------------------
# Kernels
# ----------------------------------------------------------------------------

def _linear_kernel(x_ref, w_ref, b_ref, o_ref):
    """y = x @ W + b.  x: [tm, Din], W: [Din, Dout], b: [1, Dout]."""
    y = jnp.dot(x_ref[...], w_ref[...], preferred_element_type=jnp.float32)
    o_ref[...] = (y + b_ref[...]).astype(o_ref.dtype)


def _fused_proj_kernel(x_ref, w_ref, b_ref, *out_refs, d):
    """One wide matmul x @ [W0|W1|...] + b, split into len(out_refs) outputs."""
    y = jnp.dot(x_ref[...], w_ref[...], preferred_element_type=jnp.float32)
    y = y + b_ref[...]
    for i, o_ref in enumerate(out_refs):
        o_ref[...] = y[:, i * d:(i + 1) * d].astype(o_ref.dtype)


def _proj_add_ln_kernel(x_ref, w_ref, b_ref, r_ref, g_ref, bb_ref, o_ref, *, eps):
    """out = LayerNorm(x @ W + b + residual)."""
    y = jnp.dot(x_ref[...], w_ref[...], preferred_element_type=jnp.float32)
    v = y + b_ref[...] + r_ref[...].astype(jnp.float32)
    mean = jnp.mean(v, axis=-1, keepdims=True)
    var = jnp.mean((v - mean) ** 2, axis=-1, keepdims=True)
    normed = (v - mean) * jax.lax.rsqrt(var + eps)
    o_ref[...] = (normed * g_ref[...] + bb_ref[...]).astype(o_ref.dtype)


def _ffn_add_ln_kernel(x_ref, w1_ref, b1_ref, w2_ref, b2_ref, g_ref, bb_ref,
                       o_ref, *, eps):
    """out = LayerNorm(relu(x@W1+b1)@W2 + b2 + x); hidden stays in VMEM."""
    x = x_ref[...].astype(jnp.float32)
    h = jnp.dot(x, w1_ref[...], preferred_element_type=jnp.float32) + b1_ref[...]
    h = jnp.maximum(h, 0.0)
    y = jnp.dot(h, w2_ref[...], preferred_element_type=jnp.float32) + b2_ref[...]
    v = y + x
    mean = jnp.mean(v, axis=-1, keepdims=True)
    var = jnp.mean((v - mean) ** 2, axis=-1, keepdims=True)
    normed = (v - mean) * jax.lax.rsqrt(var + eps)
    o_ref[...] = (normed * g_ref[...] + bb_ref[...]).astype(o_ref.dtype)


def _attn_compute(q_ref, k_ref, v_ref, m, o_ref, num_heads, scale):
    """Head-batched attention for one batch row.

    q_ref: [1, Tq, D], k_ref/v_ref: [1, Tk, D], m: [mq, Tk] (or None),
    o_ref: [1, Tq, D].  Heads are statically unrolled on lane slices of D.
    """
    q = q_ref[0].astype(jnp.float32)   # [Tq, D]
    k = k_ref[0].astype(jnp.float32)   # [Tk, D]
    v = v_ref[0].astype(jnp.float32)   # [Tk, D]
    dk = q.shape[-1] // num_heads
    for h in range(num_heads):
        sl = slice(h * dk, (h + 1) * dk)
        # q_h @ k_h^T without materializing a transpose.
        s = jax.lax.dot_general(q[:, sl], k[:, sl], (((1,), (1,)), ((), ())),
                                preferred_element_type=jnp.float32) * scale
        if m is not None:
            s = jnp.where(m > 0, s, jnp.float32(-1e9))
        s = s - jnp.max(s, axis=-1, keepdims=True)
        p = jnp.exp(s)
        p = p * pl.reciprocal(jnp.sum(p, axis=-1, keepdims=True), approx=True)
        oh = jnp.dot(p, v[:, sl], preferred_element_type=jnp.float32)
        o_ref[0, :, sl] = oh.astype(o_ref.dtype)


def _attn_kernel_masked(q_ref, k_ref, v_ref, m_ref, o_ref, *, num_heads, scale):
    _attn_compute(q_ref, k_ref, v_ref, m_ref[0].astype(jnp.float32), o_ref,
                  num_heads, scale)


def _attn_kernel_nomask(q_ref, k_ref, v_ref, o_ref, *, num_heads, scale):
    _attn_compute(q_ref, k_ref, v_ref, None, o_ref, num_heads, scale)


# ----------------------------------------------------------------------------
# Pallas wrappers
# ----------------------------------------------------------------------------

def linear(x, w, b):
    B, T, Din = x.shape
    Dout = w.shape[1]
    M = B * T
    tm = _row_tile(M)
    out = pl.pallas_call(
        _linear_kernel,
        out_shape=jax.ShapeDtypeStruct((M, Dout), x.dtype),
        grid=(M // tm,),
        in_specs=[
            pl.BlockSpec((tm, Din), lambda i: (i, 0)),
            pl.BlockSpec((Din, Dout), lambda i: (0, 0)),
            pl.BlockSpec((1, Dout), lambda i: (0, 0)),
        ],
        out_specs=pl.BlockSpec((tm, Dout), lambda i: (i, 0)),
        compiler_params=_PARALLEL_1D,
    )(x.reshape(M, Din), w, b.reshape(1, Dout))
    return out.reshape(B, T, Dout)


def fused_proj(x, w, b, n_out):
    """x: [B,T,Din]; w: [Din, n_out*Dout]; returns n_out arrays [B,T,Dout]."""
    B, T, Din = x.shape
    Dout = w.shape[1] // n_out
    M = B * T
    tm = _row_tile(M)
    outs = pl.pallas_call(
        functools.partial(_fused_proj_kernel, d=Dout),
        out_shape=[jax.ShapeDtypeStruct((M, Dout), x.dtype)] * n_out,
        grid=(M // tm,),
        in_specs=[
            pl.BlockSpec((tm, Din), lambda i: (i, 0)),
            pl.BlockSpec((Din, n_out * Dout), lambda i: (0, 0)),
            pl.BlockSpec((1, n_out * Dout), lambda i: (0, 0)),
        ],
        out_specs=[pl.BlockSpec((tm, Dout), lambda i: (i, 0))] * n_out,
        compiler_params=_PARALLEL_1D,
    )(x.reshape(M, Din), w, b.reshape(1, n_out * Dout))
    return tuple(o.reshape(B, T, Dout) for o in outs)


def proj_add_layernorm(x, w, b, residual, gamma, beta, eps=1e-5):
    """LayerNorm(x @ W + b + residual), fused."""
    B, T, Din = x.shape
    Dout = w.shape[1]
    M = B * T
    tm = _row_tile(M)
    out = pl.pallas_call(
        functools.partial(_proj_add_ln_kernel, eps=eps),
        out_shape=jax.ShapeDtypeStruct((M, Dout), x.dtype),
        grid=(M // tm,),
        in_specs=[
            pl.BlockSpec((tm, Din), lambda i: (i, 0)),
            pl.BlockSpec((Din, Dout), lambda i: (0, 0)),
            pl.BlockSpec((1, Dout), lambda i: (0, 0)),
            pl.BlockSpec((tm, Dout), lambda i: (i, 0)),
            pl.BlockSpec((1, Dout), lambda i: (0, 0)),
            pl.BlockSpec((1, Dout), lambda i: (0, 0)),
        ],
        out_specs=pl.BlockSpec((tm, Dout), lambda i: (i, 0)),
        compiler_params=_PARALLEL_1D,
    )(x.reshape(M, Din), w, b.reshape(1, Dout), residual.reshape(M, Dout),
      gamma.reshape(1, Dout), beta.reshape(1, Dout))
    return out.reshape(B, T, Dout)


def ffn_add_layernorm(x, w1, b1, w2, b2, gamma, beta, eps=1e-5):
    """LayerNorm(relu(x@W1+b1)@W2 + b2 + x), fully fused."""
    B, T, D = x.shape
    Dff = w1.shape[1]
    M = B * T
    tm = _row_tile(M)
    out = pl.pallas_call(
        functools.partial(_ffn_add_ln_kernel, eps=eps),
        out_shape=jax.ShapeDtypeStruct((M, D), x.dtype),
        grid=(M // tm,),
        in_specs=[
            pl.BlockSpec((tm, D), lambda i: (i, 0)),
            pl.BlockSpec((D, Dff), lambda i: (0, 0)),
            pl.BlockSpec((1, Dff), lambda i: (0, 0)),
            pl.BlockSpec((Dff, D), lambda i: (0, 0)),
            pl.BlockSpec((1, D), lambda i: (0, 0)),
            pl.BlockSpec((1, D), lambda i: (0, 0)),
            pl.BlockSpec((1, D), lambda i: (0, 0)),
        ],
        out_specs=pl.BlockSpec((tm, D), lambda i: (i, 0)),
        compiler_params=_PARALLEL_1D,
    )(x.reshape(M, D), w1, b1.reshape(1, Dff), w2, b2.reshape(1, D),
      gamma.reshape(1, D), beta.reshape(1, D))
    return out.reshape(B, T, D)


def batched_attention(q, k, v, mask, num_heads):
    """q: [B,Tq,D], k/v: [B,Tk,D], mask: [B,1,{1|Tq},Tk] or None -> [B,Tq,D]."""
    B, Tq, D = q.shape
    Tk = k.shape[1]
    scale = 1.0 / math.sqrt(D // num_heads)

    qkv_specs = [
        pl.BlockSpec((1, Tq, D), lambda b: (b, 0, 0)),
        pl.BlockSpec((1, Tk, D), lambda b: (b, 0, 0)),
        pl.BlockSpec((1, Tk, D), lambda b: (b, 0, 0)),
    ]
    if mask is not None:
        mq = mask.shape[2]                       # 1 (src) or Tq (causal)
        m3 = mask.reshape(B, mq, Tk)             # no per-head broadcast
        kern = functools.partial(_attn_kernel_masked,
                                 num_heads=num_heads, scale=scale)
        in_specs = qkv_specs + [pl.BlockSpec((1, mq, Tk), lambda b: (b, 0, 0))]
        args = (q, k, v, m3)
    else:
        kern = functools.partial(_attn_kernel_nomask,
                                 num_heads=num_heads, scale=scale)
        in_specs = qkv_specs
        args = (q, k, v)

    return pl.pallas_call(
        kern,
        out_shape=jax.ShapeDtypeStruct((B, Tq, D), q.dtype),
        grid=(B,),
        in_specs=in_specs,
        out_specs=pl.BlockSpec((1, Tq, D), lambda b: (b, 0, 0)),
        compiler_params=_PARALLEL_1D,
    )(*args)


# ----------------------------------------------------------------------------
# Decoder forward
# ----------------------------------------------------------------------------

def decoder_layer_forward(x, enc_out, lp, tgt_mask, src_mask, num_heads):
    # masked self-attention: fused QKV -> head-batched attention
    #                        -> fused out-proj + residual + LayerNorm
    q, k, v = fused_proj(x, lp["self_attn"]["w_qkv"], lp["self_attn"]["b_qkv"], 3)
    sa = batched_attention(q, k, v, tgt_mask, num_heads)
    x = proj_add_layernorm(sa, lp["self_attn"]["wo"], lp["self_attn"]["bo"],
                           x, lp["ln1_g"], lp["ln1_b"])

    # cross-attention over encoder output
    qc = linear(x, lp["cross_attn"]["wq"], lp["cross_attn"]["bq"])
    kc, vc = fused_proj(enc_out, lp["cross_attn"]["w_kv"],
                        lp["cross_attn"]["b_kv"], 2)
    ca = batched_attention(qc, kc, vc, src_mask, num_heads)
    x = proj_add_layernorm(ca, lp["cross_attn"]["wo"], lp["cross_attn"]["bo"],
                           x, lp["ln2_g"], lp["ln2_b"])

    # position-wise feed-forward, fully fused with residual + LayerNorm
    x = ffn_add_layernorm(x, lp["ffn_w1"], lp["ffn_b1"],
                          lp["ffn_w2"], lp["ffn_b2"],
                          lp["ln3_g"], lp["ln3_b"])
    return x


def transformer_decoder_forward(x, enc_out, layers_params, tgt_mask, src_mask,
                                num_heads):
    for lp in layers_params:
        x = decoder_layer_forward(x, enc_out, lp, tgt_mask, src_mask, num_heads)
    return x


# ----------------------------------------------------------------------------
# Deterministic parameter init
# ----------------------------------------------------------------------------

def init_self_attn_params(key, d_model):
    ks = jax.random.split(key, 2)
    s = 1.0 / math.sqrt(d_model)
    return {
        "w_qkv": jax.random.normal(ks[0], (d_model, 3 * d_model), jnp.float32) * s,
        "b_qkv": jnp.zeros((3 * d_model,), jnp.float32),
        "wo": jax.random.normal(ks[1], (d_model, d_model), jnp.float32) * s,
        "bo": jnp.zeros((d_model,), jnp.float32),
    }


def init_cross_attn_params(key, d_model):
    ks = jax.random.split(key, 3)
    s = 1.0 / math.sqrt(d_model)
    return {
        "wq": jax.random.normal(ks[0], (d_model, d_model), jnp.float32) * s,
        "bq": jnp.zeros((d_model,), jnp.float32),
        "w_kv": jax.random.normal(ks[1], (d_model, 2 * d_model), jnp.float32) * s,
        "b_kv": jnp.zeros((2 * d_model,), jnp.float32),
        "wo": jax.random.normal(ks[2], (d_model, d_model), jnp.float32) * s,
        "bo": jnp.zeros((d_model,), jnp.float32),
    }


def init_layer_params(key, d_model, d_ff):
    ks = jax.random.split(key, 4)
    return {
        "self_attn": init_self_attn_params(ks[0], d_model),
        "cross_attn": init_cross_attn_params(ks[1], d_model),
        "ffn_w1": jax.random.normal(ks[2], (d_model, d_ff), jnp.float32)
                  * (1.0 / math.sqrt(d_model)),
        "ffn_b1": jnp.zeros((d_ff,), jnp.float32),
        "ffn_w2": jax.random.normal(ks[3], (d_ff, d_model), jnp.float32)
                  * (1.0 / math.sqrt(d_ff)),
        "ffn_b2": jnp.zeros((d_model,), jnp.float32),
        "ln1_g": jnp.ones((d_model,), jnp.float32),
        "ln1_b": jnp.zeros((d_model,), jnp.float32),
        "ln2_g": jnp.ones((d_model,), jnp.float32),
        "ln2_b": jnp.zeros((d_model,), jnp.float32),
        "ln3_g": jnp.ones((d_model,), jnp.float32),
        "ln3_b": jnp.zeros((d_model,), jnp.float32),
    }


# ----------------------------------------------------------------------------
# Main
# ----------------------------------------------------------------------------

if __name__ == "__main__":
    B, T_tgt, T_src = 2, 8, 8
    d_model, num_heads, d_ff, num_layers = 32, 4, 64, 2

    key = jax.random.PRNGKey(0)
    k_x, k_enc, k_params = jax.random.split(key, 3)

    x = jax.random.normal(k_x, (B, T_tgt, d_model), jnp.float32)
    encoder_output = jax.random.normal(k_enc, (B, T_src, d_model), jnp.float32)

    # tgt_mask: causal [B, 1, T_tgt, T_tgt]; src_mask: all-ones [B, 1, 1, T_src]
    causal = jnp.tril(jnp.ones((T_tgt, T_tgt), jnp.float32))
    tgt_mask = jnp.broadcast_to(causal, (B, 1, T_tgt, T_tgt))
    src_mask = jnp.ones((B, 1, 1, T_src), jnp.float32)

    layer_keys = jax.random.split(k_params, num_layers)
    layers_params = [init_layer_params(lk, d_model, d_ff) for lk in layer_keys]

    fwd = jax.jit(functools.partial(transformer_decoder_forward,
                                    num_heads=num_heads))
    out = fwd(x, encoder_output, layers_params, tgt_mask, src_mask)
    out = jax.block_until_ready(out)

    assert out.shape == (B, T_tgt, d_model)
    assert jnp.all(jnp.isfinite(out))
    print("KERNEL_OK")
</pallas_src>

<mosaic_0001>
module attributes {stable_mosaic.version = 11 : i64} {
  func.func @_proj_add_ln_kernel(%arg0: i32, %arg1: memref<8x32xf32, #tpu.memory_space<vmem>>, %arg2: memref<32x32xf32, #tpu.memory_space<vmem>>, %arg3: memref<1x32xf32, #tpu.memory_space<vmem>>, %arg4: memref<8x32xf32, #tpu.memory_space<vmem>>, %arg5: memref<1x32xf32, #tpu.memory_space<vmem>>, %arg6: memref<1x32xf32, #tpu.memory_space<vmem>>, %arg7: memref<8x32xf32, #tpu.memory_space<vmem>>) attributes {dimension_semantics = [#tpu.dimension_semantics<parallel>], iteration_bounds = array<i64: 2>, scalar_prefetch = 0 : i64, scratch_operands = 0 : i64, tpu.core_type = #tpu.core_type<tc>, window_params = [{transform_indices = @transform_0, window_bounds = array<i64: 8, 32>}, {pipeline_mode = #tpu.pipeline_mode<synchronous>, transform_indices = @transform_1, window_bounds = array<i64: 32, 32>}, {pipeline_mode = #tpu.pipeline_mode<synchronous>, transform_indices = @transform_2, window_bounds = array<i64: 1, 32>}, {transform_indices = @transform_3, window_bounds = array<i64: 8, 32>}, {pipeline_mode = #tpu.pipeline_mode<synchronous>, transform_indices = @transform_4, window_bounds = array<i64: 1, 32>}, {pipeline_mode = #tpu.pipeline_mode<synchronous>, transform_indices = @transform_5, window_bounds = array<i64: 1, 32>}, {transform_indices = @transform_6, window_bounds = array<i64: 8, 32>}]} {
    %c0 = arith.constant 0 : index
    %c0_0 = arith.constant 0 : index
    %0 = vector.load %arg1[%c0, %c0_0] : memref<8x32xf32, #tpu.memory_space<vmem>>, vector<8x32xf32>
    %c0_1 = arith.constant 0 : index
    %c0_2 = arith.constant 0 : index
    %1 = vector.load %arg2[%c0_1, %c0_2] : memref<32x32xf32, #tpu.memory_space<vmem>>, vector<32x32xf32>
    %cst = arith.constant dense<0.000000e+00> : vector<8x32xf32>
    %2 = tpu.matmul %0, %1, %cst {dimension_numbers = #tpu.dot_dimension_numbers<[1], [0], [0], [1], [0, 0, 1, 1], [], []>} : vector<8x32xf32>, vector<32x32xf32>, vector<8x32xf32> -> vector<8x32xf32>
    %c0_3 = arith.constant 0 : index
    %c0_4 = arith.constant 0 : index
    %3 = vector.load %arg3[%c0_3, %c0_4] : memref<1x32xf32, #tpu.memory_space<vmem>>, vector<1x32xf32>
    %4 = vector.broadcast %3 : vector<1x32xf32> to vector<8x32xf32>
    %5 = arith.addf %2, %4 : vector<8x32xf32>
    %c0_5 = arith.constant 0 : index
    %c0_6 = arith.constant 0 : index
    %6 = vector.load %arg4[%c0_5, %c0_6] : memref<8x32xf32, #tpu.memory_space<vmem>>, vector<8x32xf32>
    %7 = arith.addf %5, %6 : vector<8x32xf32>
    %cst_7 = arith.constant dense<0.000000e+00> : vector<8xf32>
    %8 = vector.multi_reduction <add>, %7, %cst_7 [1] : vector<8x32xf32> to vector<8xf32>
    %9 = vector.shape_cast %8 : vector<8xf32> to vector<8x1xf32>
    %cst_8 = arith.constant 3.200000e+01 : f32
    %10 = vector.broadcast %cst_8 : f32 to vector<8x1xf32>
    %11 = arith.divf %9, %10 : vector<8x1xf32>
    %12 = vector.broadcast %11 : vector<8x1xf32> to vector<8x32xf32>
    %13 = arith.subf %7, %12 : vector<8x32xf32>
    %14 = arith.mulf %13, %13 : vector<8x32xf32>
    %cst_9 = arith.constant dense<0.000000e+00> : vector<8xf32>
    %15 = vector.multi_reduction <add>, %14, %cst_9 [1] : vector<8x32xf32> to vector<8xf32>
    %16 = vector.shape_cast %15 : vector<8xf32> to vector<8x1xf32>
    %cst_10 = arith.constant 3.200000e+01 : f32
    %17 = vector.broadcast %cst_10 : f32 to vector<8x1xf32>
    %18 = arith.divf %16, %17 : vector<8x1xf32>
    %19 = vector.broadcast %11 : vector<8x1xf32> to vector<8x32xf32>
    %20 = arith.subf %7, %19 : vector<8x32xf32>
    %cst_11 = arith.constant 9.99999974E-6 : f32
    %21 = vector.broadcast %cst_11 : f32 to vector<8x1xf32>
    %22 = arith.addf %18, %21 : vector<8x1xf32>
    %23 = math.rsqrt %22 : vector<8x1xf32>
    %24 = vector.broadcast %23 : vector<8x1xf32> to vector<8x32xf32>
    %25 = arith.mulf %20, %24 : vector<8x32xf32>
    %c0_12 = arith.constant 0 : index
    %c0_13 = arith.constant 0 : index
    %26 = vector.load %arg5[%c0_12, %c0_13] : memref<1x32xf32, #tpu.memory_space<vmem>>, vector<1x32xf32>
    %27 = vector.broadcast %26 : vector<1x32xf32> to vector<8x32xf32>
    %28 = arith.mulf %25, %27 : vector<8x32xf32>
    %c0_14 = arith.constant 0 : index
    %c0_15 = arith.constant 0 : index
    %29 = vector.load %arg6[%c0_14, %c0_15] : memref<1x32xf32, #tpu.memory_space<vmem>>, vector<1x32xf32>
    %30 = vector.broadcast %29 : vector<1x32xf32> to vector<8x32xf32>
    %31 = arith.addf %28, %30 : vector<8x32xf32>
    %c0_16 = arith.constant 0 : index
    %c0_17 = arith.constant 0 : index
    %32 = vector.load %arg7[%c0_16, %c0_17] : memref<8x32xf32, #tpu.memory_space<vmem>>, vector<8x32xf32>
    tpu.vector_store %arg7[%c0_16, %c0_17], %31 {strides = array<i32>} : memref<8x32xf32, #tpu.memory_space<vmem>>, vector<8x32xf32>,
    return
  }
  func.func @transform_0(%arg0: i32) -> (i32, i32) {
    %c0_i32 = arith.constant 0 : i32
    %c0_i32_0 = arith.constant 0 : i32
    return %arg0, %c0_i32 : i32, i32
  }
  func.func @transform_1(%arg0: i32) -> (i32, i32) {
    %c0_i32 = arith.constant 0 : i32
    %c0_i32_0 = arith.constant 0 : i32
    %c0_i32_1 = arith.constant 0 : i32
    return %c0_i32, %c0_i32_0 : i32, i32
  }
  func.func @transform_2(%arg0: i32) -> (i32, i32) {
    %c0_i32 = arith.constant 0 : i32
    %c0_i32_0 = arith.constant 0 : i32
    %c0_i32_1 = arith.constant 0 : i32
    return %c0_i32, %c0_i32_0 : i32, i32
  }
  func.func @transform_3(%arg0: i32) -> (i32, i32) {
    %c0_i32 = arith.constant 0 : i32
    %c0_i32_0 = arith.constant 0 : i32
    return %arg0, %c0_i32 : i32, i32
  }
  func.func @transform_4(%arg0: i32) -> (i32, i32) {
    %c0_i32 = arith.constant 0 : i32
    %c0_i32_0 = arith.constant 0 : i32
    %c0_i32_1 = arith.constant 0 : i32
    return %c0_i32, %c0_i32_0 : i32, i32
  }
  func.func @transform_5(%arg0: i32) -> (i32, i32) {
    %c0_i32 = arith.constant 0 : i32
    %c0_i32_0 = arith.constant 0 : i32
    %c0_i32_1 = arith.constant 0 : i32
    return %c0_i32, %c0_i32_0 : i32, i32
  }
  func.func @transform_6(%arg0: i32) -> (i32, i32) {
    %c0_i32 = arith.constant 0 : i32
    %c0_i32_0 = arith.constant 0 : i32
    return %arg0, %c0_i32 : i32, i32
  }
}

module attributes {stable_mosaic.version = 11 : i64} {
  func.func @_fused_proj_kernel(%arg0: i32, %arg1: memref<8x32xf32, #tpu.memory_space<vmem>>, %arg2: memref<32x96xf32, #tpu.memory_space<vmem>>, %arg3: memref<1x96xf32, #tpu.memory_space<vmem>>, %arg4: memref<8x32xf32, #tpu.memory_space<vmem>>, %arg5: memref<8x32xf32, #tpu.memory_space<vmem>>, %arg6: memref<8x32xf32, #tpu.memory_space<vmem>>) attributes {dimension_semantics = [#tpu.dimension_semantics<parallel>], iteration_bounds = array<i64: 2>, scalar_prefetch = 0 : i64, scratch_operands = 0 : i64, tpu.core_type = #tpu.core_type<tc>, window_params = [{transform_indices = @transform_0, window_bounds = array<i64: 8, 32>}, {pipeline_mode = #tpu.pipeline_mode<synchronous>, transform_indices = @transform_1, window_bounds = array<i64: 32, 96>}, {pipeline_mode = #tpu.pipeline_mode<synchronous>, transform_indices = @transform_2, window_bounds = array<i64: 1, 96>}, {transform_indices = @transform_3, window_bounds = array<i64: 8, 32>}, {transform_indices = @transform_4, window_bounds = array<i64: 8, 32>}, {transform_indices = @transform_5, window_bounds = array<i64: 8, 32>}]} {
    %c0 = arith.constant 0 : index
    %c0_0 = arith.constant 0 : index
    %0 = vector.load %arg1[%c0, %c0_0] : memref<8x32xf32, #tpu.memory_space<vmem>>, vector<8x32xf32>
    %c0_1 = arith.constant 0 : index
    %c0_2 = arith.constant 0 : index
    %1 = vector.load %arg2[%c0_1, %c0_2] : memref<32x96xf32, #tpu.memory_space<vmem>>, vector<32x96xf32>
    %cst = arith.constant dense<0.000000e+00> : vector<8x96xf32>
    %2 = tpu.matmul %0, %1, %cst {dimension_numbers = #tpu.dot_dimension_numbers<[1], [0], [0], [1], [0, 0, 1, 1], [], []>} : vector<8x32xf32>, vector<32x96xf32>, vector<8x96xf32> -> vector<8x96xf32>
    %c0_3 = arith.constant 0 : index
    %c0_4 = arith.constant 0 : index
    %3 = vector.load %arg3[%c0_3, %c0_4] : memref<1x96xf32, #tpu.memory_space<vmem>>, vector<1x96xf32>
    %4 = vector.broadcast %3 : vector<1x96xf32> to vector<8x96xf32>
    %5 = arith.addf %2, %4 : vector<8x96xf32>
    %6 = vector.extract_strided_slice %5 {offsets = [0, 0], sizes = [8, 32], strides = [1, 1]} : vector<8x96xf32> to vector<8x32xf32>
    %c0_5 = arith.constant 0 : index
    %c0_6 = arith.constant 0 : index
    %7 = vector.load %arg4[%c0_5, %c0_6] : memref<8x32xf32, #tpu.memory_space<vmem>>, vector<8x32xf32>
    tpu.vector_store %arg4[%c0_5, %c0_6], %6 {strides = array<i32>} : memref<8x32xf32, #tpu.memory_space<vmem>>, vector<8x32xf32>,
    %8 = vector.extract_strided_slice %5 {offsets = [0, 32], sizes = [8, 32], strides = [1, 1]} : vector<8x96xf32> to vector<8x32xf32>
    %c0_7 = arith.constant 0 : index
    %c0_8 = arith.constant 0 : index
    %9 = vector.load %arg5[%c0_7, %c0_8] : memref<8x32xf32, #tpu.memory_space<vmem>>, vector<8x32xf32>
    tpu.vector_store %arg5[%c0_7, %c0_8], %8 {strides = array<i32>} : memref<8x32xf32, #tpu.memory_space<vmem>>, vector<8x32xf32>,
    %10 = vector.extract_strided_slice %5 {offsets = [0, 64], sizes = [8, 32], strides = [1, 1]} : vector<8x96xf32> to vector<8x32xf32>
    %c0_9 = arith.constant 0 : index
    %c0_10 = arith.constant 0 : index
    %11 = vector.load %arg6[%c0_9, %c0_10] : memref<8x32xf32, #tpu.memory_space<vmem>>, vector<8x32xf32>
    tpu.vector_store %arg6[%c0_9, %c0_10], %10 {strides = array<i32>} : memref<8x32xf32, #tpu.memory_space<vmem>>, vector<8x32xf32>,
    return
  }
  func.func @transform_0(%arg0: i32) -> (i32, i32) {
    %c0_i32 = arith.constant 0 : i32
    %c0_i32_0 = arith.constant 0 : i32
    return %arg0, %c0_i32 : i32, i32
  }
  func.func @transform_1(%arg0: i32) -> (i32, i32) {
    %c0_i32 = arith.constant 0 : i32
    %c0_i32_0 = arith.constant 0 : i32
    %c0_i32_1 = arith.constant 0 : i32
    return %c0_i32, %c0_i32_0 : i32, i32
  }
  func.func @transform_2(%arg0: i32) -> (i32, i32) {
    %c0_i32 = arith.constant 0 : i32
    %c0_i32_0 = arith.constant 0 : i32
    %c0_i32_1 = arith.constant 0 : i32
    return %c0_i32, %c0_i32_0 : i32, i32
  }
  func.func @transform_3(%arg0: i32) -> (i32, i32) {
    %c0_i32 = arith.constant 0 : i32
    %c0_i32_0 = arith.constant 0 : i32
    return %arg0, %c0_i32 : i32, i32
  }
  func.func @transform_4(%arg0: i32) -> (i32, i32) {
    %c0_i32 = arith.constant 0 : i32
    %c0_i32_0 = arith.constant 0 : i32
    return %arg0, %c0_i32 : i32, i32
  }
  func.func @transform_5(%arg0: i32) -> (i32, i32) {
    %c0_i32 = arith.constant 0 : i32
    %c0_i32_0 = arith.constant 0 : i32
    return %arg0, %c0_i32 : i32, i32
  }
}

module attributes {stable_mosaic.version = 11 : i64} {
  func.func @_linear_kernel(%arg0: i32, %arg1: memref<8x32xf32, #tpu.memory_space<vmem>>, %arg2: memref<32x32xf32, #tpu.memory_space<vmem>>, %arg3: memref<1x32xf32, #tpu.memory_space<vmem>>, %arg4: memref<8x32xf32, #tpu.memory_space<vmem>>) attributes {dimension_semantics = [#tpu.dimension_semantics<parallel>], iteration_bounds = array<i64: 2>, scalar_prefetch = 0 : i64, scratch_operands = 0 : i64, tpu.core_type = #tpu.core_type<tc>, window_params = [{transform_indices = @transform_0, window_bounds = array<i64: 8, 32>}, {pipeline_mode = #tpu.pipeline_mode<synchronous>, transform_indices = @transform_1, window_bounds = array<i64: 32, 32>}, {pipeline_mode = #tpu.pipeline_mode<synchronous>, transform_indices = @transform_2, window_bounds = array<i64: 1, 32>}, {transform_indices = @transform_3, window_bounds = array<i64: 8, 32>}]} {
    %c0 = arith.constant 0 : index
    %c0_0 = arith.constant 0 : index
    %0 = vector.load %arg1[%c0, %c0_0] : memref<8x32xf32, #tpu.memory_space<vmem>>, vector<8x32xf32>
    %c0_1 = arith.constant 0 : index
    %c0_2 = arith.constant 0 : index
    %1 = vector.load %arg2[%c0_1, %c0_2] : memref<32x32xf32, #tpu.memory_space<vmem>>, vector<32x32xf32>
    %cst = arith.constant dense<0.000000e+00> : vector<8x32xf32>
    %2 = tpu.matmul %0, %1, %cst {dimension_numbers = #tpu.dot_dimension_numbers<[1], [0], [0], [1], [0, 0, 1, 1], [], []>} : vector<8x32xf32>, vector<32x32xf32>, vector<8x32xf32> -> vector<8x32xf32>
    %c0_3 = arith.constant 0 : index
    %c0_4 = arith.constant 0 : index
    %3 = vector.load %arg3[%c0_3, %c0_4] : memref<1x32xf32, #tpu.memory_space<vmem>>, vector<1x32xf32>
    %4 = vector.broadcast %3 : vector<1x32xf32> to vector<8x32xf32>
    %5 = arith.addf %2, %4 : vector<8x32xf32>
    %c0_5 = arith.constant 0 : index
    %c0_6 = arith.constant 0 : index
    %6 = vector.load %arg4[%c0_5, %c0_6] : memref<8x32xf32, #tpu.memory_space<vmem>>, vector<8x32xf32>
    tpu.vector_store %arg4[%c0_5, %c0_6], %5 {strides = array<i32>} : memref<8x32xf32, #tpu.memory_space<vmem>>, vector<8x32xf32>,
    return
  }
  func.func @transform_0(%arg0: i32) -> (i32, i32) {
    %c0_i32 = arith.constant 0 : i32
    %c0_i32_0 = arith.constant 0 : i32
    return %arg0, %c0_i32 : i32, i32
  }
  func.func @transform_1(%arg0: i32) -> (i32, i32) {
    %c0_i32 = arith.constant 0 : i32
    %c0_i32_0 = arith.constant 0 : i32
    %c0_i32_1 = arith.constant 0 : i32
    return %c0_i32, %c0_i32_0 : i32, i32
  }
  func.func @transform_2(%arg0: i32) -> (i32, i32) {
    %c0_i32 = arith.constant 0 : i32
    %c0_i32_0 = arith.constant 0 : i32
    %c0_i32_1 = arith.constant 0 : i32
    return %c0_i32, %c0_i32_0 : i32, i32
  }
  func.func @transform_3(%arg0: i32) -> (i32, i32) {
    %c0_i32 = arith.constant 0 : i32
    %c0_i32_0 = arith.constant 0 : i32
    return %arg0, %c0_i32 : i32, i32
  }
}

module attributes {stable_mosaic.version = 11 : i64} {
  func.func @_attn_kernel_masked(%arg0: i32, %arg1: memref<1x8x32xf32, #tpu.memory_space<vmem>>, %arg2: memref<1x8x32xf32, #tpu.memory_space<vmem>>, %arg3: memref<1x8x32xf32, #tpu.memory_space<vmem>>, %arg4: memref<1x8x8xf32, #tpu.memory_space<vmem>>, %arg5: memref<1x8x32xf32, #tpu.memory_space<vmem>>) attributes {dimension_semantics = [#tpu.dimension_semantics<parallel>], iteration_bounds = array<i64: 2>, scalar_prefetch = 0 : i64, scratch_operands = 0 : i64, tpu.core_type = #tpu.core_type<tc>, window_params = [{transform_indices = @transform_0, window_bounds = array<i64: 1, 8, 32>}, {transform_indices = @transform_1, window_bounds = array<i64: 1, 8, 32>}, {transform_indices = @transform_2, window_bounds = array<i64: 1, 8, 32>}, {transform_indices = @transform_3, window_bounds = array<i64: 1, 8, 8>}, {transform_indices = @transform_4, window_bounds = array<i64: 1, 8, 32>}]} {
    %c0 = arith.constant 0 : index
    %c0_0 = arith.constant 0 : index
    %c0_1 = arith.constant 0 : index
    %0 = vector.load %arg4[%c0, %c0_0, %c0_1] : memref<1x8x8xf32, #tpu.memory_space<vmem>>, vector<1x8x8xf32>
    %1 = vector.shape_cast %0 : vector<1x8x8xf32> to vector<8x8xf32>
    %c0_2 = arith.constant 0 : index
    %c0_3 = arith.constant 0 : index
    %c0_4 = arith.constant 0 : index
    %2 = vector.load %arg1[%c0_2, %c0_3, %c0_4] : memref<1x8x32xf32, #tpu.memory_space<vmem>>, vector<1x8x32xf32>
    %3 = vector.shape_cast %2 : vector<1x8x32xf32> to vector<8x32xf32>
    %c0_5 = arith.constant 0 : index
    %c0_6 = arith.constant 0 : index
    %c0_7 = arith.constant 0 : index
    %4 = vector.load %arg2[%c0_5, %c0_6, %c0_7] : memref<1x8x32xf32, #tpu.memory_space<vmem>>, vector<1x8x32xf32>
    %5 = vector.shape_cast %4 : vector<1x8x32xf32> to vector<8x32xf32>
    %c0_8 = arith.constant 0 : index
    %c0_9 = arith.constant 0 : index
    %c0_10 = arith.constant 0 : index
    %6 = vector.load %arg3[%c0_8, %c0_9, %c0_10] : memref<1x8x32xf32, #tpu.memory_space<vmem>>, vector<1x8x32xf32>
    %7 = vector.shape_cast %6 : vector<1x8x32xf32> to vector<8x32xf32>
    %8 = vector.extract_strided_slice %3 {offsets = [0, 0], sizes = [8, 8], strides = [1, 1]} : vector<8x32xf32> to vector<8x8xf32>
    %9 = vector.extract_strided_slice %5 {offsets = [0, 0], sizes = [8, 8], strides = [1, 1]} : vector<8x32xf32> to vector<8x8xf32>
    %cst = arith.constant dense<0.000000e+00> : vector<8x8xf32>
    %10 = tpu.matmul %8, %9, %cst {dimension_numbers = #tpu.dot_dimension_numbers<[1], [1], [0], [0], [0, 0, 1, 0], [], []>} : vector<8x8xf32>, vector<8x8xf32>, vector<8x8xf32> -> vector<8x8xf32>
    %cst_11 = arith.constant 0.353553385 : f32
    %11 = vector.broadcast %cst_11 : f32 to vector<8x8xf32>
    %12 = arith.mulf %10, %11 : vector<8x8xf32>
    %cst_12 = arith.constant 0.000000e+00 : f32
    %13 = vector.broadcast %cst_12 : f32 to vector<8x8xf32>
    %14 = arith.cmpf ogt, %1, %13 : vector<8x8xf32>
    %cst_13 = arith.constant -1.000000e+09 : f32
    %15 = vector.broadcast %cst_13 : f32 to vector<8x8xf32>
    %16 = arith.select %14, %12, %15 : vector<8x8xi1>, vector<8x8xf32>
    %cst_14 = arith.constant dense<0xFF800000> : vector<8xf32>
    %17 = vector.multi_reduction <maximumf>, %16, %cst_14 [1] : vector<8x8xf32> to vector<8xf32>
    %18 = vector.shape_cast %17 : vector<8xf32> to vector<8x1xf32>
    %19 = vector.broadcast %18 : vector<8x1xf32> to vector<8x8xf32>
    %20 = arith.subf %16, %19 : vector<8x8xf32>
    %21 = math.exp %20 : vector<8x8xf32>
    %cst_15 = arith.constant dense<0.000000e+00> : vector<8xf32>
    %22 = vector.multi_reduction <add>, %21, %cst_15 [1] : vector<8x8xf32> to vector<8xf32>
    %23 = vector.shape_cast %22 : vector<8xf32> to vector<8x1xf32>
    %24 = tpu.reciprocal %23 {approx = true} : vector<8x1xf32> -> vector<8x1xf32>
    %25 = vector.broadcast %24 : vector<8x1xf32> to vector<8x8xf32>
    %26 = arith.mulf %21, %25 : vector<8x8xf32>
    %27 = vector.extract_strided_slice %7 {offsets = [0, 0], sizes = [8, 8], strides = [1, 1]} : vector<8x32xf32> to vector<8x8xf32>
    %cst_16 = arith.constant dense<0.000000e+00> : vector<8x8xf32>
    %28 = tpu.matmul %26, %27, %cst_16 {dimension_numbers = #tpu.dot_dimension_numbers<[1], [0], [0], [1], [0, 0, 1, 1], [], []>} : vector<8x8xf32>, vector<8x8xf32>, vector<8x8xf32> -> vector<8x8xf32>
    %c0_17 = arith.constant 0 : index
    %c0_18 = arith.constant 0 : index
    %c0_19 = arith.constant 0 : index
    %29 = vector.load %arg5[%c0_17, %c0_18, %c0_19] : memref<1x8x32xf32, #tpu.memory_space<vmem>>, vector<1x8x8xf32>
    %30 = vector.shape_cast %29 : vector<1x8x8xf32> to vector<8x8xf32>
    %31 = vector.shape_cast %28 : vector<8x8xf32> to vector<1x8x8xf32>
    tpu.vector_store %arg5[%c0_17, %c0_18, %c0_19], %31 {strides = array<i32>} : memref<1x8x32xf32, #tpu.memory_space<vmem>>, vector<1x8x8xf32>,
    %32 = vector.extract_strided_slice %3 {offsets = [0, 8], sizes = [8, 8], strides = [1, 1]} : vector<8x32xf32> to vector<8x8xf32>
    %33 = vector.extract_strided_slice %5 {offsets = [0, 8], sizes = [8, 8], strides = [1, 1]} : vector<8x32xf32> to vector<8x8xf32>
    %cst_20 = arith.constant dense<0.000000e+00> : vector<8x8xf32>
    %34 = tpu.matmul %32, %33, %cst_20 {dimension_numbers = #tpu.dot_dimension_numbers<[1], [1], [0], [0], [0, 0, 1, 0], [], []>} : vector<8x8xf32>, vector<8x8xf32>, vector<8x8xf32> -> vector<8x8xf32>
    %cst_21 = arith.constant 0.353553385 : f32
    %35 = vector.broadcast %cst_21 : f32 to vector<8x8xf32>
    %36 = arith.mulf %34, %35 : vector<8x8xf32>
    %cst_22 = arith.constant 0.000000e+00 : f32
    %37 = vector.broadcast %cst_22 : f32 to vector<8x8xf32>
    %38 = arith.cmpf ogt, %1, %37 : vector<8x8xf32>
    %cst_23 = arith.constant -1.000000e+09 : f32
    %39 = vector.broadcast %cst_23 : f32 to vector<8x8xf32>
    %40 = arith.select %38, %36, %39 : vector<8x8xi1>, vector<8x8xf32>
    %cst_24 = arith.constant dense<0xFF800000> : vector<8xf32>
    %41 = vector.multi_reduction <maximumf>, %40, %cst_24 [1] : vector<8x8xf32> to vector<8xf32>
    %42 = vector.shape_cast %41 : vector<8xf32> to vector<8x1xf32>
    %43 = vector.broadcast %42 : vector<8x1xf32> to vector<8x8xf32>
    %44 = arith.subf %40, %43 : vector<8x8xf32>
    %45 = math.exp %44 : vector<8x8xf32>
    %cst_25 = arith.constant dense<0.000000e+00> : vector<8xf32>
    %46 = vector.multi_reduction <add>, %45, %cst_25 [1] : vector<8x8xf32> to vector<8xf32>
    %47 = vector.shape_cast %46 : vector<8xf32> to vector<8x1xf32>
    %48 = tpu.reciprocal %47 {approx = true} : vector<8x1xf32> -> vector<8x1xf32>
    %49 = vector.broadcast %48 : vector<8x1xf32> to vector<8x8xf32>
    %50 = arith.mulf %45, %49 : vector<8x8xf32>
    %51 = vector.extract_strided_slice %7 {offsets = [0, 8], sizes = [8, 8], strides = [1, 1]} : vector<8x32xf32> to vector<8x8xf32>
    %cst_26 = arith.constant dense<0.000000e+00> : vector<8x8xf32>
    %52 = tpu.matmul %50, %51, %cst_26 {dimension_numbers = #tpu.dot_dimension_numbers<[1], [0], [0], [1], [0, 0, 1, 1], [], []>} : vector<8x8xf32>, vector<8x8xf32>, vector<8x8xf32> -> vector<8x8xf32>
    %c0_27 = arith.constant 0 : index
    %c0_28 = arith.constant 0 : index
    %c8 = arith.constant 8 : index
    %53 = vector.load %arg5[%c0_27, %c0_28, %c8] : memref<1x8x32xf32, #tpu.memory_space<vmem>>, vector<1x8x8xf32>
    %54 = vector.shape_cast %53 : vector<1x8x8xf32> to vector<8x8xf32>
    %55 = vector.shape_cast %52 : vector<8x8xf32> to vector<1x8x8xf32>
    tpu.vector_store %arg5[%c0_27, %c0_28, %c8], %55 {strides = array<i32>} : memref<1x8x32xf32, #tpu.memory_space<vmem>>, vector<1x8x8xf32>,
    %56 = vector.extract_strided_slice %3 {offsets = [0, 16], sizes = [8, 8], strides = [1, 1]} : vector<8x32xf32> to vector<8x8xf32>
    %57 = vector.extract_strided_slice %5 {offsets = [0, 16], sizes = [8, 8], strides = [1, 1]} : vector<8x32xf32> to vector<8x8xf32>
    %cst_29 = arith.constant dense<0.000000e+00> : vector<8x8xf32>
    %58 = tpu.matmul %56, %57, %cst_29 {dimension_numbers = #tpu.dot_dimension_numbers<[1], [1], [0], [0], [0, 0, 1, 0], [], []>} : vector<8x8xf32>, vector<8x8xf32>, vector<8x8xf32> -> vector<8x8xf32>
    %cst_30 = arith.constant 0.353553385 : f32
    %59 = vector.broadcast %cst_30 : f32 to vector<8x8xf32>
    %60 = arith.mulf %58, %59 : vector<8x8xf32>
    %cst_31 = arith.constant 0.000000e+00 : f32
    %61 = vector.broadcast %cst_31 : f32 to vector<8x8xf32>
    %62 = arith.cmpf ogt, %1, %61 : vector<8x8xf32>
    %cst_32 = arith.constant -1.000000e+09 : f32
    %63 = vector.broadcast %cst_32 : f32 to vector<8x8xf32>
    %64 = arith.select %62, %60, %63 : vector<8x8xi1>, vector<8x8xf32>
    %cst_33 = arith.constant dense<0xFF800000> : vector<8xf32>
    %65 = vector.multi_reduction <maximumf>, %64, %cst_33 [1] : vector<8x8xf32> to vector<8xf32>
    %66 = vector.shape_cast %65 : vector<8xf32> to vector<8x1xf32>
    %67 = vector.broadcast %66 : vector<8x1xf32> to vector<8x8xf32>
    %68 = arith.subf %64, %67 : vector<8x8xf32>
    %69 = math.exp %68 : vector<8x8xf32>
    %cst_34 = arith.constant dense<0.000000e+00> : vector<8xf32>
    %70 = vector.multi_reduction <add>, %69, %cst_34 [1] : vector<8x8xf32> to vector<8xf32>
    %71 = vector.shape_cast %70 : vector<8xf32> to vector<8x1xf32>
    %72 = tpu.reciprocal %71 {approx = true} : vector<8x1xf32> -> vector<8x1xf32>
    %73 = vector.broadcast %72 : vector<8x1xf32> to vector<8x8xf32>
    %74 = arith.mulf %69, %73 : vector<8x8xf32>
    %75 = vector.extract_strided_slice %7 {offsets = [0, 16], sizes = [8, 8], strides = [1, 1]} : vector<8x32xf32> to vector<8x8xf32>
    %cst_35 = arith.constant dense<0.000000e+00> : vector<8x8xf32>
    %76 = tpu.matmul %74, %75, %cst_35 {dimension_numbers = #tpu.dot_dimension_numbers<[1], [0], [0], [1], [0, 0, 1, 1], [], []>} : vector<8x8xf32>, vector<8x8xf32>, vector<8x8xf32> -> vector<8x8xf32>
    %c0_36 = arith.constant 0 : index
    %c0_37 = arith.constant 0 : index
    %c16 = arith.constant 16 : index
    %77 = vector.load %arg5[%c0_36, %c0_37, %c16] : memref<1x8x32xf32, #tpu.memory_space<vmem>>, vector<1x8x8xf32>
    %78 = vector.shape_cast %77 : vector<1x8x8xf32> to vector<8x8xf32>
    %79 = vector.shape_cast %76 : vector<8x8xf32> to vector<1x8x8xf32>
    tpu.vector_store %arg5[%c0_36, %c0_37, %c16], %79 {strides = array<i32>} : memref<1x8x32xf32, #tpu.memory_space<vmem>>, vector<1x8x8xf32>,
    %80 = vector.extract_strided_slice %3 {offsets = [0, 24], sizes = [8, 8], strides = [1, 1]} : vector<8x32xf32> to vector<8x8xf32>
    %81 = vector.extract_strided_slice %5 {offsets = [0, 24], sizes = [8, 8], strides = [1, 1]} : vector<8x32xf32> to vector<8x8xf32>
    %cst_38 = arith.constant dense<0.000000e+00> : vector<8x8xf32>
    %82 = tpu.matmul %80, %81, %cst_38 {dimension_numbers = #tpu.dot_dimension_numbers<[1], [1], [0], [0], [0, 0, 1, 0], [], []>} : vector<8x8xf32>, vector<8x8xf32>, vector<8x8xf32> -> vector<8x8xf32>
    %cst_39 = arith.constant 0.353553385 : f32
    %83 = vector.broadcast %cst_39 : f32 to vector<8x8xf32>
    %84 = arith.mulf %82, %83 : vector<8x8xf32>
    %cst_40 = arith.constant 0.000000e+00 : f32
    %85 = vector.broadcast %cst_40 : f32 to vector<8x8xf32>
    %86 = arith.cmpf ogt, %1, %85 : vector<8x8xf32>
    %cst_41 = arith.constant -1.000000e+09 : f32
    %87 = vector.broadcast %cst_41 : f32 to vector<8x8xf32>
    %88 = arith.select %86, %84, %87 : vector<8x8xi1>, vector<8x8xf32>
    %cst_42 = arith.constant dense<0xFF800000> : vector<8xf32>
    %89 = vector.multi_reduction <maximumf>, %88, %cst_42 [1] : vector<8x8xf32> to vector<8xf32>
    %90 = vector.shape_cast %89 : vector<8xf32> to vector<8x1xf32>
    %91 = vector.broadcast %90 : vector<8x1xf32> to vector<8x8xf32>
    %92 = arith.subf %88, %91 : vector<8x8xf32>
    %93 = math.exp %92 : vector<8x8xf32>
    %cst_43 = arith.constant dense<0.000000e+00> : vector<8xf32>
    %94 = vector.multi_reduction <add>, %93, %cst_43 [1] : vector<8x8xf32> to vector<8xf32>
    %95 = vector.shape_cast %94 : vector<8xf32> to vector<8x1xf32>
    %96 = tpu.reciprocal %95 {approx = true} : vector<8x1xf32> -> vector<8x1xf32>
    %97 = vector.broadcast %96 : vector<8x1xf32> to vector<8x8xf32>
    %98 = arith.mulf %93, %97 : vector<8x8xf32>
    %99 = vector.extract_strided_slice %7 {offsets = [0, 24], sizes = [8, 8], strides = [1, 1]} : vector<8x32xf32> to vector<8x8xf32>
    %cst_44 = arith.constant dense<0.000000e+00> : vector<8x8xf32>
    %100 = tpu.matmul %98, %99, %cst_44 {dimension_numbers = #tpu.dot_dimension_numbers<[1], [0], [0], [1], [0, 0, 1, 1], [], []>} : vector<8x8xf32>, vector<8x8xf32>, vector<8x8xf32> -> vector<8x8xf32>
    %c0_45 = arith.constant 0 : index
    %c0_46 = arith.constant 0 : index
    %c24 = arith.constant 24 : index
    %101 = vector.load %arg5[%c0_45, %c0_46, %c24] : memref<1x8x32xf32, #tpu.memory_space<vmem>>, vector<1x8x8xf32>
    %102 = vector.shape_cast %101 : vector<1x8x8xf32> to vector<8x8xf32>
    %103 = vector.shape_cast %100 : vector<8x8xf32> to vector<1x8x8xf32>
    tpu.vector_store %arg5[%c0_45, %c0_46, %c24], %103 {strides = array<i32>} : memref<1x8x32xf32, #tpu.memory_space<vmem>>, vector<1x8x8xf32>,
    return
  }
  func.func @transform_0(%arg0: i32) -> (i32, i32, i32) {
    %c0_i32 = arith.constant 0 : i32
    %c0_i32_0 = arith.constant 0 : i32
    %c0_i32_1 = arith.constant 0 : i32
    return %arg0, %c0_i32, %c0_i32_0 : i32, i32, i32
  }
  func.func @transform_1(%arg0: i32) -> (i32, i32, i32) {
    %c0_i32 = arith.constant 0 : i32
    %c0_i32_0 = arith.constant 0 : i32
    %c0_i32_1 = arith.constant 0 : i32
    return %arg0, %c0_i32, %c0_i32_0 : i32, i32, i32
  }
  func.func @transform_2(%arg0: i32) -> (i32, i32, i32) {
    %c0_i32 = arith.constant 0 : i32
    %c0_i32_0 = arith.constant 0 : i32
    %c0_i32_1 = arith.constant 0 : i32
    return %arg0, %c0_i32, %c0_i32_0 : i32, i32, i32
  }
  func.func @transform_3(%arg0: i32) -> (i32, i32, i32) {
    %c0_i32 = arith.constant 0 : i32
    %c0_i32_0 = arith.constant 0 : i32
    %c0_i32_1 = arith.constant 0 : i32
    return %arg0, %c0_i32, %c0_i32_0 : i32, i32, i32
  }
  func.func @transform_4(%arg0: i32) -> (i32, i32, i32) {
    %c0_i32 = arith.constant 0 : i32
    %c0_i32_0 = arith.constant 0 : i32
    %c0_i32_1 = arith.constant 0 : i32
    return %arg0, %c0_i32, %c0_i32_0 : i32, i32, i32
  }
}

module attributes {stable_mosaic.version = 11 : i64} {
  func.func @_fused_proj_kernel(%arg0: i32, %arg1: memref<8x32xf32, #tpu.memory_space<vmem>>, %arg2: memref<32x64xf32, #tpu.memory_space<vmem>>, %arg3: memref<1x64xf32, #tpu.memory_space<vmem>>, %arg4: memref<8x32xf32, #tpu.memory_space<vmem>>, %arg5: memref<8x32xf32, #tpu.memory_space<vmem>>) attributes {dimension_semantics = [#tpu.dimension_semantics<parallel>], iteration_bounds = array<i64: 2>, scalar_prefetch = 0 : i64, scratch_operands = 0 : i64, tpu.core_type = #tpu.core_type<tc>, window_params = [{transform_indices = @transform_0, window_bounds = array<i64: 8, 32>}, {pipeline_mode = #tpu.pipeline_mode<synchronous>, transform_indices = @transform_1, window_bounds = array<i64: 32, 64>}, {pipeline_mode = #tpu.pipeline_mode<synchronous>, transform_indices = @transform_2, window_bounds = array<i64: 1, 64>}, {transform_indices = @transform_3, window_bounds = array<i64: 8, 32>}, {transform_indices = @transform_4, window_bounds = array<i64: 8, 32>}]} {
    %c0 = arith.constant 0 : index
    %c0_0 = arith.constant 0 : index
    %0 = vector.load %arg1[%c0, %c0_0] : memref<8x32xf32, #tpu.memory_space<vmem>>, vector<8x32xf32>
    %c0_1 = arith.constant 0 : index
    %c0_2 = arith.constant 0 : index
    %1 = vector.load %arg2[%c0_1, %c0_2] : memref<32x64xf32, #tpu.memory_space<vmem>>, vector<32x64xf32>
    %cst = arith.constant dense<0.000000e+00> : vector<8x64xf32>
    %2 = tpu.matmul %0, %1, %cst {dimension_numbers = #tpu.dot_dimension_numbers<[1], [0], [0], [1], [0, 0, 1, 1], [], []>} : vector<8x32xf32>, vector<32x64xf32>, vector<8x64xf32> -> vector<8x64xf32>
    %c0_3 = arith.constant 0 : index
    %c0_4 = arith.constant 0 : index
    %3 = vector.load %arg3[%c0_3, %c0_4] : memref<1x64xf32, #tpu.memory_space<vmem>>, vector<1x64xf32>
    %4 = vector.broadcast %3 : vector<1x64xf32> to vector<8x64xf32>
    %5 = arith.addf %2, %4 : vector<8x64xf32>
    %6 = vector.extract_strided_slice %5 {offsets = [0, 0], sizes = [8, 32], strides = [1, 1]} : vector<8x64xf32> to vector<8x32xf32>
    %c0_5 = arith.constant 0 : index
    %c0_6 = arith.constant 0 : index
    %7 = vector.load %arg4[%c0_5, %c0_6] : memref<8x32xf32, #tpu.memory_space<vmem>>, vector<8x32xf32>
    tpu.vector_store %arg4[%c0_5, %c0_6], %6 {strides = array<i32>} : memref<8x32xf32, #tpu.memory_space<vmem>>, vector<8x32xf32>,
    %8 = vector.extract_strided_slice %5 {offsets = [0, 32], sizes = [8, 32], strides = [1, 1]} : vector<8x64xf32> to vector<8x32xf32>
    %c0_7 = arith.constant 0 : index
    %c0_8 = arith.constant 0 : index
    %9 = vector.load %arg5[%c0_7, %c0_8] : memref<8x32xf32, #tpu.memory_space<vmem>>, vector<8x32xf32>
    tpu.vector_store %arg5[%c0_7, %c0_8], %8 {strides = array<i32>} : memref<8x32xf32, #tpu.memory_space<vmem>>, vector<8x32xf32>,
    return
  }
  func.func @transform_0(%arg0: i32) -> (i32, i32) {
    %c0_i32 = arith.constant 0 : i32
    %c0_i32_0 = arith.constant 0 : i32
    return %arg0, %c0_i32 : i32, i32
  }
  func.func @transform_1(%arg0: i32) -> (i32, i32) {
    %c0_i32 = arith.constant 0 : i32
    %c0_i32_0 = arith.constant 0 : i32
    %c0_i32_1 = arith.constant 0 : i32
    return %c0_i32, %c0_i32_0 : i32, i32
  }
  func.func @transform_2(%arg0: i32) -> (i32, i32) {
    %c0_i32 = arith.constant 0 : i32
    %c0_i32_0 = arith.constant 0 : i32
    %c0_i32_1 = arith.constant 0 : i32
    return %c0_i32, %c0_i32_0 : i32, i32
  }
  func.func @transform_3(%arg0: i32) -> (i32, i32) {
    %c0_i32 = arith.constant 0 : i32
    %c0_i32_0 = arith.constant 0 : i32
    return %arg0, %c0_i32 : i32, i32
  }
  func.func @transform_4(%arg0: i32) -> (i32, i32) {
    %c0_i32 = arith.constant 0 : i32
    %c0_i32_0 = arith.constant 0 : i32
    return %arg0, %c0_i32 : i32, i32
  }
}

module attributes {stable_mosaic.version = 11 : i64} {
  func.func @_attn_kernel_masked(%arg0: i32, %arg1: memref<1x8x32xf32, #tpu.memory_space<vmem>>, %arg2: memref<1x8x32xf32, #tpu.memory_space<vmem>>, %arg3: memref<1x8x32xf32, #tpu.memory_space<vmem>>, %arg4: memref<1x1x8xf32, #tpu.memory_space<vmem>>, %arg5: memref<1x8x32xf32, #tpu.memory_space<vmem>>) attributes {dimension_semantics = [#tpu.dimension_semantics<parallel>], iteration_bounds = array<i64: 2>, scalar_prefetch = 0 : i64, scratch_operands = 0 : i64, tpu.core_type = #tpu.core_type<tc>, window_params = [{transform_indices = @transform_0, window_bounds = array<i64: 1, 8, 32>}, {transform_indices = @transform_1, window_bounds = array<i64: 1, 8, 32>}, {transform_indices = @transform_2, window_bounds = array<i64: 1, 8, 32>}, {transform_indices = @transform_3, window_bounds = array<i64: 1, 1, 8>}, {transform_indices = @transform_4, window_bounds = array<i64: 1, 8, 32>}]} {
    %c0 = arith.constant 0 : index
    %c0_0 = arith.constant 0 : index
    %c0_1 = arith.constant 0 : index
    %0 = vector.load %arg4[%c0, %c0_0, %c0_1] : memref<1x1x8xf32, #tpu.memory_space<vmem>>, vector<1x1x8xf32>
    %1 = vector.shape_cast %0 : vector<1x1x8xf32> to vector<1x8xf32>
    %c0_2 = arith.constant 0 : index
    %c0_3 = arith.constant 0 : index
    %c0_4 = arith.constant 0 : index
    %2 = vector.load %arg1[%c0_2, %c0_3, %c0_4] : memref<1x8x32xf32, #tpu.memory_space<vmem>>, vector<1x8x32xf32>
    %3 = vector.shape_cast %2 : vector<1x8x32xf32> to vector<8x32xf32>
    %c0_5 = arith.constant 0 : index
    %c0_6 = arith.constant 0 : index
    %c0_7 = arith.constant 0 : index
    %4 = vector.load %arg2[%c0_5, %c0_6, %c0_7] : memref<1x8x32xf32, #tpu.memory_space<vmem>>, vector<1x8x32xf32>
    %5 = vector.shape_cast %4 : vector<1x8x32xf32> to vector<8x32xf32>
    %c0_8 = arith.constant 0 : index
    %c0_9 = arith.constant 0 : index
    %c0_10 = arith.constant 0 : index
    %6 = vector.load %arg3[%c0_8, %c0_9, %c0_10] : memref<1x8x32xf32, #tpu.memory_space<vmem>>, vector<1x8x32xf32>
    %7 = vector.shape_cast %6 : vector<1x8x32xf32> to vector<8x32xf32>
    %8 = vector.extract_strided_slice %3 {offsets = [0, 0], sizes = [8, 8], strides = [1, 1]} : vector<8x32xf32> to vector<8x8xf32>
    %9 = vector.extract_strided_slice %5 {offsets = [0, 0], sizes = [8, 8], strides = [1, 1]} : vector<8x32xf32> to vector<8x8xf32>
    %cst = arith.constant dense<0.000000e+00> : vector<8x8xf32>
    %10 = tpu.matmul %8, %9, %cst {dimension_numbers = #tpu.dot_dimension_numbers<[1], [1], [0], [0], [0, 0, 1, 0], [], []>} : vector<8x8xf32>, vector<8x8xf32>, vector<8x8xf32> -> vector<8x8xf32>
    %cst_11 = arith.constant 0.353553385 : f32
    %11 = vector.broadcast %cst_11 : f32 to vector<8x8xf32>
    %12 = arith.mulf %10, %11 : vector<8x8xf32>
    %cst_12 = arith.constant 0.000000e+00 : f32
    %13 = vector.broadcast %cst_12 : f32 to vector<1x8xf32>
    %14 = arith.cmpf ogt, %1, %13 : vector<1x8xf32>
    %cst_13 = arith.constant -1.000000e+09 : f32
    %15 = vector.shape_cast %14 : vector<1x8xi1> to vector<1x8xi1>
    %16 = vector.broadcast %15 : vector<1x8xi1> to vector<8x8xi1>
    %17 = vector.broadcast %cst_13 : f32 to vector<8x8xf32>
    %18 = arith.select %16, %12, %17 : vector<8x8xi1>, vector<8x8xf32>
    %cst_14 = arith.constant dense<0xFF800000> : vector<8xf32>
    %19 = vector.multi_reduction <maximumf>, %18, %cst_14 [1] : vector<8x8xf32> to vector<8xf32>
    %20 = vector.shape_cast %19 : vector<8xf32> to vector<8x1xf32>
    %21 = vector.broadcast %20 : vector<8x1xf32> to vector<8x8xf32>
    %22 = arith.subf %18, %21 : vector<8x8xf32>
    %23 = math.exp %22 : vector<8x8xf32>
    %cst_15 = arith.constant dense<0.000000e+00> : vector<8xf32>
    %24 = vector.multi_reduction <add>, %23, %cst_15 [1] : vector<8x8xf32> to vector<8xf32>
    %25 = vector.shape_cast %24 : vector<8xf32> to vector<8x1xf32>
    %26 = tpu.reciprocal %25 {approx = true} : vector<8x1xf32> -> vector<8x1xf32>
    %27 = vector.broadcast %26 : vector<8x1xf32> to vector<8x8xf32>
    %28 = arith.mulf %23, %27 : vector<8x8xf32>
    %29 = vector.extract_strided_slice %7 {offsets = [0, 0], sizes = [8, 8], strides = [1, 1]} : vector<8x32xf32> to vector<8x8xf32>
    %cst_16 = arith.constant dense<0.000000e+00> : vector<8x8xf32>
    %30 = tpu.matmul %28, %29, %cst_16 {dimension_numbers = #tpu.dot_dimension_numbers<[1], [0], [0], [1], [0, 0, 1, 1], [], []>} : vector<8x8xf32>, vector<8x8xf32>, vector<8x8xf32> -> vector<8x8xf32>
    %c0_17 = arith.constant 0 : index
    %c0_18 = arith.constant 0 : index
    %c0_19 = arith.constant 0 : index
    %31 = vector.load %arg5[%c0_17, %c0_18, %c0_19] : memref<1x8x32xf32, #tpu.memory_space<vmem>>, vector<1x8x8xf32>
    %32 = vector.shape_cast %31 : vector<1x8x8xf32> to vector<8x8xf32>
    %33 = vector.shape_cast %30 : vector<8x8xf32> to vector<1x8x8xf32>
    tpu.vector_store %arg5[%c0_17, %c0_18, %c0_19], %33 {strides = array<i32>} : memref<1x8x32xf32, #tpu.memory_space<vmem>>, vector<1x8x8xf32>,
    %34 = vector.extract_strided_slice %3 {offsets = [0, 8], sizes = [8, 8], strides = [1, 1]} : vector<8x32xf32> to vector<8x8xf32>
    %35 = vector.extract_strided_slice %5 {offsets = [0, 8], sizes = [8, 8], strides = [1, 1]} : vector<8x32xf32> to vector<8x8xf32>
    %cst_20 = arith.constant dense<0.000000e+00> : vector<8x8xf32>
    %36 = tpu.matmul %34, %35, %cst_20 {dimension_numbers = #tpu.dot_dimension_numbers<[1], [1], [0], [0], [0, 0, 1, 0], [], []>} : vector<8x8xf32>, vector<8x8xf32>, vector<8x8xf32> -> vector<8x8xf32>
    %cst_21 = arith.constant 0.353553385 : f32
    %37 = vector.broadcast %cst_21 : f32 to vector<8x8xf32>
    %38 = arith.mulf %36, %37 : vector<8x8xf32>
    %cst_22 = arith.constant 0.000000e+00 : f32
    %39 = vector.broadcast %cst_22 : f32 to vector<1x8xf32>
    %40 = arith.cmpf ogt, %1, %39 : vector<1x8xf32>
    %cst_23 = arith.constant -1.000000e+09 : f32
    %41 = vector.shape_cast %40 : vector<1x8xi1> to vector<1x8xi1>
    %42 = vector.broadcast %41 : vector<1x8xi1> to vector<8x8xi1>
    %43 = vector.broadcast %cst_23 : f32 to vector<8x8xf32>
    %44 = arith.select %42, %38, %43 : vector<8x8xi1>, vector<8x8xf32>
    %cst_24 = arith.constant dense<0xFF800000> : vector<8xf32>
    %45 = vector.multi_reduction <maximumf>, %44, %cst_24 [1] : vector<8x8xf32> to vector<8xf32>
    %46 = vector.shape_cast %45 : vector<8xf32> to vector<8x1xf32>
    %47 = vector.broadcast %46 : vector<8x1xf32> to vector<8x8xf32>
    %48 = arith.subf %44, %47 : vector<8x8xf32>
    %49 = math.exp %48 : vector<8x8xf32>
    %cst_25 = arith.constant dense<0.000000e+00> : vector<8xf32>
    %50 = vector.multi_reduction <add>, %49, %cst_25 [1] : vector<8x8xf32> to vector<8xf32>
    %51 = vector.shape_cast %50 : vector<8xf32> to vector<8x1xf32>
    %52 = tpu.reciprocal %51 {approx = true} : vector<8x1xf32> -> vector<8x1xf32>
    %53 = vector.broadcast %52 : vector<8x1xf32> to vector<8x8xf32>
    %54 = arith.mulf %49, %53 : vector<8x8xf32>
    %55 = vector.extract_strided_slice %7 {offsets = [0, 8], sizes = [8, 8], strides = [1, 1]} : vector<8x32xf32> to vector<8x8xf32>
    %cst_26 = arith.constant dense<0.000000e+00> : vector<8x8xf32>
    %56 = tpu.matmul %54, %55, %cst_26 {dimension_numbers = #tpu.dot_dimension_numbers<[1], [0], [0], [1], [0, 0, 1, 1], [], []>} : vector<8x8xf32>, vector<8x8xf32>, vector<8x8xf32> -> vector<8x8xf32>
    %c0_27 = arith.constant 0 : index
    %c0_28 = arith.constant 0 : index
    %c8 = arith.constant 8 : index
    %57 = vector.load %arg5[%c0_27, %c0_28, %c8] : memref<1x8x32xf32, #tpu.memory_space<vmem>>, vector<1x8x8xf32>
    %58 = vector.shape_cast %57 : vector<1x8x8xf32> to vector<8x8xf32>
    %59 = vector.shape_cast %56 : vector<8x8xf32> to vector<1x8x8xf32>
    tpu.vector_store %arg5[%c0_27, %c0_28, %c8], %59 {strides = array<i32>} : memref<1x8x32xf32, #tpu.memory_space<vmem>>, vector<1x8x8xf32>,
    %60 = vector.extract_strided_slice %3 {offsets = [0, 16], sizes = [8, 8], strides = [1, 1]} : vector<8x32xf32> to vector<8x8xf32>
    %61 = vector.extract_strided_slice %5 {offsets = [0, 16], sizes = [8, 8], strides = [1, 1]} : vector<8x32xf32> to vector<8x8xf32>
    %cst_29 = arith.constant dense<0.000000e+00> : vector<8x8xf32>
    %62 = tpu.matmul %60, %61, %cst_29 {dimension_numbers = #tpu.dot_dimension_numbers<[1], [1], [0], [0], [0, 0, 1, 0], [], []>} : vector<8x8xf32>, vector<8x8xf32>, vector<8x8xf32> -> vector<8x8xf32>
    %cst_30 = arith.constant 0.353553385 : f32
    %63 = vector.broadcast %cst_30 : f32 to vector<8x8xf32>
    %64 = arith.mulf %62, %63 : vector<8x8xf32>
    %cst_31 = arith.constant 0.000000e+00 : f32
    %65 = vector.broadcast %cst_31 : f32 to vector<1x8xf32>
    %66 = arith.cmpf ogt, %1, %65 : vector<1x8xf32>
    %cst_32 = arith.constant -1.000000e+09 : f32
    %67 = vector.shape_cast %66 : vector<1x8xi1> to vector<1x8xi1>
    %68 = vector.broadcast %67 : vector<1x8xi1> to vector<8x8xi1>
    %69 = vector.broadcast %cst_32 : f32 to vector<8x8xf32>
    %70 = arith.select %68, %64, %69 : vector<8x8xi1>, vector<8x8xf32>
    %cst_33 = arith.constant dense<0xFF800000> : vector<8xf32>
    %71 = vector.multi_reduction <maximumf>, %70, %cst_33 [1] : vector<8x8xf32> to vector<8xf32>
    %72 = vector.shape_cast %71 : vector<8xf32> to vector<8x1xf32>
    %73 = vector.broadcast %72 : vector<8x1xf32> to vector<8x8xf32>
    %74 = arith.subf %70, %73 : vector<8x8xf32>
    %75 = math.exp %74 : vector<8x8xf32>
    %cst_34 = arith.constant dense<0.000000e+00> : vector<8xf32>
    %76 = vector.multi_reduction <add>, %75, %cst_34 [1] : vector<8x8xf32> to vector<8xf32>
    %77 = vector.shape_cast %76 : vector<8xf32> to vector<8x1xf32>
    %78 = tpu.reciprocal %77 {approx = true} : vector<8x1xf32> -> vector<8x1xf32>
    %79 = vector.broadcast %78 : vector<8x1xf32> to vector<8x8xf32>
    %80 = arith.mulf %75, %79 : vector<8x8xf32>
    %81 = vector.extract_strided_slice %7 {offsets = [0, 16], sizes = [8, 8], strides = [1, 1]} : vector<8x32xf32> to vector<8x8xf32>
    %cst_35 = arith.constant dense<0.000000e+00> : vector<8x8xf32>
    %82 = tpu.matmul %80, %81, %cst_35 {dimension_numbers = #tpu.dot_dimension_numbers<[1], [0], [0], [1], [0, 0, 1, 1], [], []>} : vector<8x8xf32>, vector<8x8xf32>, vector<8x8xf32> -> vector<8x8xf32>
    %c0_36 = arith.constant 0 : index
    %c0_37 = arith.constant 0 : index
    %c16 = arith.constant 16 : index
    %83 = vector.load %arg5[%c0_36, %c0_37, %c16] : memref<1x8x32xf32, #tpu.memory_space<vmem>>, vector<1x8x8xf32>
    %84 = vector.shape_cast %83 : vector<1x8x8xf32> to vector<8x8xf32>
    %85 = vector.shape_cast %82 : vector<8x8xf32> to vector<1x8x8xf32>
    tpu.vector_store %arg5[%c0_36, %c0_37, %c16], %85 {strides = array<i32>} : memref<1x8x32xf32, #tpu.memory_space<vmem>>, vector<1x8x8xf32>,
    %86 = vector.extract_strided_slice %3 {offsets = [0, 24], sizes = [8, 8], strides = [1, 1]} : vector<8x32xf32> to vector<8x8xf32>
    %87 = vector.extract_strided_slice %5 {offsets = [0, 24], sizes = [8, 8], strides = [1, 1]} : vector<8x32xf32> to vector<8x8xf32>
    %cst_38 = arith.constant dense<0.000000e+00> : vector<8x8xf32>
    %88 = tpu.matmul %86, %87, %cst_38 {dimension_numbers = #tpu.dot_dimension_numbers<[1], [1], [0], [0], [0, 0, 1, 0], [], []>} : vector<8x8xf32>, vector<8x8xf32>, vector<8x8xf32> -> vector<8x8xf32>
    %cst_39 = arith.constant 0.353553385 : f32
    %89 = vector.broadcast %cst_39 : f32 to vector<8x8xf32>
    %90 = arith.mulf %88, %89 : vector<8x8xf32>
    %cst_40 = arith.constant 0.000000e+00 : f32
    %91 = vector.broadcast %cst_40 : f32 to vector<1x8xf32>
    %92 = arith.cmpf ogt, %1, %91 : vector<1x8xf32>
    %cst_41 = arith.constant -1.000000e+09 : f32
    %93 = vector.shape_cast %92 : vector<1x8xi1> to vector<1x8xi1>
    %94 = vector.broadcast %93 : vector<1x8xi1> to vector<8x8xi1>
    %95 = vector.broadcast %cst_41 : f32 to vector<8x8xf32>
    %96 = arith.select %94, %90, %95 : vector<8x8xi1>, vector<8x8xf32>
    %cst_42 = arith.constant dense<0xFF800000> : vector<8xf32>
    %97 = vector.multi_reduction <maximumf>, %96, %cst_42 [1] : vector<8x8xf32> to vector<8xf32>
    %98 = vector.shape_cast %97 : vector<8xf32> to vector<8x1xf32>
    %99 = vector.broadcast %98 : vector<8x1xf32> to vector<8x8xf32>
    %100 = arith.subf %96, %99 : vector<8x8xf32>
    %101 = math.exp %100 : vector<8x8xf32>
    %cst_43 = arith.constant dense<0.000000e+00> : vector<8xf32>
    %102 = vector.multi_reduction <add>, %101, %cst_43 [1] : vector<8x8xf32> to vector<8xf32>
    %103 = vector.shape_cast %102 : vector<8xf32> to vector<8x1xf32>
    %104 = tpu.reciprocal %103 {approx = true} : vector<8x1xf32> -> vector<8x1xf32>
    %105 = vector.broadcast %104 : vector<8x1xf32> to vector<8x8xf32>
    %106 = arith.mulf %101, %105 : vector<8x8xf32>
    %107 = vector.extract_strided_slice %7 {offsets = [0, 24], sizes = [8, 8], strides = [1, 1]} : vector<8x32xf32> to vector<8x8xf32>
    %cst_44 = arith.constant dense<0.000000e+00> : vector<8x8xf32>
    %108 = tpu.matmul %106, %107, %cst_44 {dimension_numbers = #tpu.dot_dimension_numbers<[1], [0], [0], [1], [0, 0, 1, 1], [], []>} : vector<8x8xf32>, vector<8x8xf32>, vector<8x8xf32> -> vector<8x8xf32>
    %c0_45 = arith.constant 0 : index
    %c0_46 = arith.constant 0 : index
    %c24 = arith.constant 24 : index
    %109 = vector.load %arg5[%c0_45, %c0_46, %c24] : memref<1x8x32xf32, #tpu.memory_space<vmem>>, vector<1x8x8xf32>
    %110 = vector.shape_cast %109 : vector<1x8x8xf32> to vector<8x8xf32>
    %111 = vector.shape_cast %108 : vector<8x8xf32> to vector<1x8x8xf32>
    tpu.vector_store %arg5[%c0_45, %c0_46, %c24], %111 {strides = array<i32>} : memref<1x8x32xf32, #tpu.memory_space<vmem>>, vector<1x8x8xf32>,
    return
  }
  func.func @transform_0(%arg0: i32) -> (i32, i32, i32) {
    %c0_i32 = arith.constant 0 : i32
    %c0_i32_0 = arith.constant 0 : i32
    %c0_i32_1 = arith.constant 0 : i32
    return %arg0, %c0_i32, %c0_i32_0 : i32, i32, i32
  }
  func.func @transform_1(%arg0: i32) -> (i32, i32, i32) {
    %c0_i32 = arith.constant 0 : i32
    %c0_i32_0 = arith.constant 0 : i32
    %c0_i32_1 = arith.constant 0 : i32
    return %arg0, %c0_i32, %c0_i32_0 : i32, i32, i32
  }
  func.func @transform_2(%arg0: i32) -> (i32, i32, i32) {
    %c0_i32 = arith.constant 0 : i32
    %c0_i32_0 = arith.constant 0 : i32
    %c0_i32_1 = arith.constant 0 : i32
    return %arg0, %c0_i32, %c0_i32_0 : i32, i32, i32
  }
  func.func @transform_3(%arg0: i32) -> (i32, i32, i32) {
    %c0_i32 = arith.constant 0 : i32
    %c0_i32_0 = arith.constant 0 : i32
    %c0_i32_1 = arith.constant 0 : i32
    return %arg0, %c0_i32, %c0_i32_0 : i32, i32, i32
  }
  func.func @transform_4(%arg0: i32) -> (i32, i32, i32) {
    %c0_i32 = arith.constant 0 : i32
    %c0_i32_0 = arith.constant 0 : i32
    %c0_i32_1 = arith.constant 0 : i32
    return %arg0, %c0_i32, %c0_i32_0 : i32, i32, i32
  }
}

module attributes {stable_mosaic.version = 11 : i64} {
  func.func @_ffn_add_ln_kernel(%arg0: i32, %arg1: memref<8x32xf32, #tpu.memory_space<vmem>>, %arg2: memref<32x64xf32, #tpu.memory_space<vmem>>, %arg3: memref<1x64xf32, #tpu.memory_space<vmem>>, %arg4: memref<64x32xf32, #tpu.memory_space<vmem>>, %arg5: memref<1x32xf32, #tpu.memory_space<vmem>>, %arg6: memref<1x32xf32, #tpu.memory_space<vmem>>, %arg7: memref<1x32xf32, #tpu.memory_space<vmem>>, %arg8: memref<8x32xf32, #tpu.memory_space<vmem>>) attributes {dimension_semantics = [#tpu.dimension_semantics<parallel>], iteration_bounds = array<i64: 2>, scalar_prefetch = 0 : i64, scratch_operands = 0 : i64, tpu.core_type = #tpu.core_type<tc>, window_params = [{transform_indices = @transform_0, window_bounds = array<i64: 8, 32>}, {pipeline_mode = #tpu.pipeline_mode<synchronous>, transform_indices = @transform_1, window_bounds = array<i64: 32, 64>}, {pipeline_mode = #tpu.pipeline_mode<synchronous>, transform_indices = @transform_2, window_bounds = array<i64: 1, 64>}, {pipeline_mode = #tpu.pipeline_mode<synchronous>, transform_indices = @transform_3, window_bounds = array<i64: 64, 32>}, {pipeline_mode = #tpu.pipeline_mode<synchronous>, transform_indices = @transform_4, window_bounds = array<i64: 1, 32>}, {pipeline_mode = #tpu.pipeline_mode<synchronous>, transform_indices = @transform_5, window_bounds = array<i64: 1, 32>}, {pipeline_mode = #tpu.pipeline_mode<synchronous>, transform_indices = @transform_6, window_bounds = array<i64: 1, 32>}, {transform_indices = @transform_7, window_bounds = array<i64: 8, 32>}]} {
    %c0 = arith.constant 0 : index
    %c0_0 = arith.constant 0 : index
    %0 = vector.load %arg1[%c0, %c0_0] : memref<8x32xf32, #tpu.memory_space<vmem>>, vector<8x32xf32>
    %c0_1 = arith.constant 0 : index
    %c0_2 = arith.constant 0 : index
    %1 = vector.load %arg2[%c0_1, %c0_2] : memref<32x64xf32, #tpu.memory_space<vmem>>, vector<32x64xf32>
    %cst = arith.constant dense<0.000000e+00> : vector<8x64xf32>
    %2 = tpu.matmul %0, %1, %cst {dimension_numbers = #tpu.dot_dimension_numbers<[1], [0], [0], [1], [0, 0, 1, 1], [], []>} : vector<8x32xf32>, vector<32x64xf32>, vector<8x64xf32> -> vector<8x64xf32>
    %c0_3 = arith.constant 0 : index
    %c0_4 = arith.constant 0 : index
    %3 = vector.load %arg3[%c0_3, %c0_4] : memref<1x64xf32, #tpu.memory_space<vmem>>, vector<1x64xf32>
    %4 = vector.broadcast %3 : vector<1x64xf32> to vector<8x64xf32>
    %5 = arith.addf %2, %4 : vector<8x64xf32>
    %cst_5 = arith.constant 0.000000e+00 : f32
    %6 = vector.broadcast %cst_5 : f32 to vector<8x64xf32>
    %7 = arith.maximumf %5, %6 : vector<8x64xf32>
    %c0_6 = arith.constant 0 : index
    %c0_7 = arith.constant 0 : index
    %8 = vector.load %arg4[%c0_6, %c0_7] : memref<64x32xf32, #tpu.memory_space<vmem>>, vector<64x32xf32>
    %cst_8 = arith.constant dense<0.000000e+00> : vector<8x32xf32>
    %9 = tpu.matmul %7, %8, %cst_8 {dimension_numbers = #tpu.dot_dimension_numbers<[1], [0], [0], [1], [0, 0, 1, 1], [], []>} : vector<8x64xf32>, vector<64x32xf32>, vector<8x32xf32> -> vector<8x32xf32>
    %c0_9 = arith.constant 0 : index
    %c0_10 = arith.constant 0 : index
    %10 = vector.load %arg5[%c0_9, %c0_10] : memref<1x32xf32, #tpu.memory_space<vmem>>, vector<1x32xf32>
    %11 = vector.broadcast %10 : vector<1x32xf32> to vector<8x32xf32>
    %12 = arith.addf %9, %11 : vector<8x32xf32>
    %13 = arith.addf %12, %0 : vector<8x32xf32>
    %cst_11 = arith.constant dense<0.000000e+00> : vector<8xf32>
    %14 = vector.multi_reduction <add>, %13, %cst_11 [1] : vector<8x32xf32> to vector<8xf32>
    %15 = vector.shape_cast %14 : vector<8xf32> to vector<8x1xf32>
    %cst_12 = arith.constant 3.200000e+01 : f32
    %16 = vector.broadcast %cst_12 : f32 to vector<8x1xf32>
    %17 = arith.divf %15, %16 : vector<8x1xf32>
    %18 = vector.broadcast %17 : vector<8x1xf32> to vector<8x32xf32>
    %19 = arith.subf %13, %18 : vector<8x32xf32>
    %20 = arith.mulf %19, %19 : vector<8x32xf32>
    %cst_13 = arith.constant dense<0.000000e+00> : vector<8xf32>
    %21 = vector.multi_reduction <add>, %20, %cst_13 [1] : vector<8x32xf32> to vector<8xf32>
    %22 = vector.shape_cast %21 : vector<8xf32> to vector<8x1xf32>
    %cst_14 = arith.constant 3.200000e+01 : f32
    %23 = vector.broadcast %cst_14 : f32 to vector<8x1xf32>
    %24 = arith.divf %22, %23 : vector<8x1xf32>
    %25 = vector.broadcast %17 : vector<8x1xf32> to vector<8x32xf32>
    %26 = arith.subf %13, %25 : vector<8x32xf32>
    %cst_15 = arith.constant 9.99999974E-6 : f32
    %27 = vector.broadcast %cst_15 : f32 to vector<8x1xf32>
    %28 = arith.addf %24, %27 : vector<8x1xf32>
    %29 = math.rsqrt %28 : vector<8x1xf32>
    %30 = vector.broadcast %29 : vector<8x1xf32> to vector<8x32xf32>
    %31 = arith.mulf %26, %30 : vector<8x32xf32>
    %c0_16 = arith.constant 0 : index
    %c0_17 = arith.constant 0 : index
    %32 = vector.load %arg6[%c0_16, %c0_17] : memref<1x32xf32, #tpu.memory_space<vmem>>, vector<1x32xf32>
    %33 = vector.broadcast %32 : vector<1x32xf32> to vector<8x32xf32>
    %34 = arith.mulf %31, %33 : vector<8x32xf32>
    %c0_18 = arith.constant 0 : index
    %c0_19 = arith.constant 0 : index
    %35 = vector.load %arg7[%c0_18, %c0_19] : memref<1x32xf32, #tpu.memory_space<vmem>>, vector<1x32xf32>
    %36 = vector.broadcast %35 : vector<1x32xf32> to vector<8x32xf32>
    %37 = arith.addf %34, %36 : vector<8x32xf32>
    %c0_20 = arith.constant 0 : index
    %c0_21 = arith.constant 0 : index
    %38 = vector.load %arg8[%c0_20, %c0_21] : memref<8x32xf32, #tpu.memory_space<vmem>>, vector<8x32xf32>
    tpu.vector_store %arg8[%c0_20, %c0_21], %37 {strides = array<i32>} : memref<8x32xf32, #tpu.memory_space<vmem>>, vector<8x32xf32>,
    return
  }
  func.func @transform_0(%arg0: i32) -> (i32, i32) {
    %c0_i32 = arith.constant 0 : i32
    %c0_i32_0 = arith.constant 0 : i32
    return %arg0, %c0_i32 : i32, i32
  }
  func.func @transform_1(%arg0: i32) -> (i32, i32) {
    %c0_i32 = arith.constant 0 : i32
    %c0_i32_0 = arith.constant 0 : i32
    %c0_i32_1 = arith.constant 0 : i32
    return %c0_i32, %c0_i32_0 : i32, i32
  }
  func.func @transform_2(%arg0: i32) -> (i32, i32) {
    %c0_i32 = arith.constant 0 : i32
    %c0_i32_0 = arith.constant 0 : i32
    %c0_i32_1 = arith.constant 0 : i32
    return %c0_i32, %c0_i32_0 : i32, i32
  }
  func.func @transform_3(%arg0: i32) -> (i32, i32) {
    %c0_i32 = arith.constant 0 : i32
    %c0_i32_0 = arith.constant 0 : i32
    %c0_i32_1 = arith.constant 0 : i32
    return %c0_i32, %c0_i32_0 : i32, i32
  }
  func.func @transform_4(%arg0: i32) -> (i32, i32) {
    %c0_i32 = arith.constant 0 : i32
    %c0_i32_0 = arith.constant 0 : i32
    %c0_i32_1 = arith.constant 0 : i32
    return %c0_i32, %c0_i32_0 : i32, i32
  }
  func.func @transform_5(%arg0: i32) -> (i32, i32) {
    %c0_i32 = arith.constant 0 : i32
    %c0_i32_0 = arith.constant 0 : i32
    %c0_i32_1 = arith.constant 0 : i32
    return %c0_i32, %c0_i32_0 : i32, i32
  }
  func.func @transform_6(%arg0: i32) -> (i32, i32) {
    %c0_i32 = arith.constant 0 : i32
    %c0_i32_0 = arith.constant 0 : i32
    %c0_i32_1 = arith.constant 0 : i32
    return %c0_i32, %c0_i32_0 : i32, i32
  }
  func.func @transform_7(%arg0: i32) -> (i32, i32) {
    %c0_i32 = arith.constant 0 : i32
    %c0_i32_0 = arith.constant 0 : i32
    return %arg0, %c0_i32 : i32, i32
  }
}

module attributes {stable_mosaic.version = 11 : i64} {
  func.func @_ffn_add_ln_kernel(%arg0: i32, %arg1: memref<8x32xf32, #tpu.memory_space<vmem>>, %arg2: memref<32x64xf32, #tpu.memory_space<vmem>>, %arg3: memref<1x64xf32, #tpu.memory_space<vmem>>, %arg4: memref<64x32xf32, #tpu.memory_space<vmem>>, %arg5: memref<1x32xf32, #tpu.memory_space<vmem>>, %arg6: memref<1x32xf32, #tpu.memory_space<vmem>>, %arg7: memref<1x32xf32, #tpu.memory_space<vmem>>, %arg8: memref<8x32xf32, #tpu.memory_space<vmem>>) attributes {dimension_semantics = [#tpu.dimension_semantics<parallel>], iteration_bounds = array<i64: 2>, scalar_prefetch = 0 : i64, scratch_operands = 0 : i64, tpu.core_type = #tpu.core_type<tc>, window_params = [{transform_indices = @transform_0, window_bounds = array<i64: 8, 32>}, {pipeline_mode = #tpu.pipeline_mode<synchronous>, transform_indices = @transform_1, window_bounds = array<i64: 32, 64>}, {pipeline_mode = #tpu.pipeline_mode<synchronous>, transform_indices = @transform_2, window_bounds = array<i64: 1, 64>}, {pipeline_mode = #tpu.pipeline_mode<synchronous>, transform_indices = @transform_3, window_bounds = array<i64: 64, 32>}, {pipeline_mode = #tpu.pipeline_mode<synchronous>, transform_indices = @transform_4, window_bounds = array<i64: 1, 32>}, {pipeline_mode = #tpu.pipeline_mode<synchronous>, transform_indices = @transform_5, window_bounds = array<i64: 1, 32>}, {pipeline_mode = #tpu.pipeline_mode<synchronous>, transform_indices = @transform_6, window_bounds = array<i64: 1, 32>}, {transform_indices = @transform_7, window_bounds = array<i64: 8, 32>}]} {
    %c0 = arith.constant 0 : index
    %c0_0 = arith.constant 0 : index
    %0 = vector.load %arg1[%c0, %c0_0] : memref<8x32xf32, #tpu.memory_space<vmem>>, vector<8x32xf32>
    %c0_1 = arith.constant 0 : index
    %c0_2 = arith.constant 0 : index
    %1 = vector.load %arg2[%c0_1, %c0_2] : memref<32x64xf32, #tpu.memory_space<vmem>>, vector<32x64xf32>
    %cst = arith.constant dense<0.000000e+00> : vector<8x64xf32>
    %2 = tpu.matmul %0, %1, %cst {dimension_numbers = #tpu.dot_dimension_numbers<[1], [0], [0], [1], [0, 0, 1, 1], [], []>} : vector<8x32xf32>, vector<32x64xf32>, vector<8x64xf32> -> vector<8x64xf32>
    %c0_3 = arith.constant 0 : index
    %c0_4 = arith.constant 0 : index
    %3 = vector.load %arg3[%c0_3, %c0_4] : memref<1x64xf32, #tpu.memory_space<vmem>>, vector<1x64xf32>
    %4 = vector.broadcast %3 : vector<1x64xf32> to vector<8x64xf32>
    %5 = arith.addf %2, %4 : vector<8x64xf32>
    %cst_5 = arith.constant 0.000000e+00 : f32
    %6 = vector.broadcast %cst_5 : f32 to vector<8x64xf32>
    %7 = arith.maximumf %5, %6 : vector<8x64xf32>
    %c0_6 = arith.constant 0 : index
    %c0_7 = arith.constant 0 : index
    %8 = vector.load %arg4[%c0_6, %c0_7] : memref<64x32xf32, #tpu.memory_space<vmem>>, vector<64x32xf32>
    %cst_8 = arith.constant dense<0.000000e+00> : vector<8x32xf32>
    %9 = tpu.matmul %7, %8, %cst_8 {dimension_numbers = #tpu.dot_dimension_numbers<[1], [0], [0], [1], [0, 0, 1, 1], [], []>} : vector<8x64xf32>, vector<64x32xf32>, vector<8x32xf32> -> vector<8x32xf32>
    %c0_9 = arith.constant 0 : index
    %c0_10 = arith.constant 0 : index
    %10 = vector.load %arg5[%c0_9, %c0_10] : memref<1x32xf32, #tpu.memory_space<vmem>>, vector<1x32xf32>
    %11 = vector.broadcast %10 : vector<1x32xf32> to vector<8x32xf32>
    %12 = arith.addf %9, %11 : vector<8x32xf32>
    %13 = arith.addf %12, %0 : vector<8x32xf32>
    %cst_11 = arith.constant dense<0.000000e+00> : vector<8xf32>
    %14 = vector.multi_reduction <add>, %13, %cst_11 [1] : vector<8x32xf32> to vector<8xf32>
    %15 = vector.shape_cast %14 : vector<8xf32> to vector<8x1xf32>
    %cst_12 = arith.constant 3.200000e+01 : f32
    %16 = vector.broadcast %cst_12 : f32 to vector<8x1xf32>
    %17 = arith.divf %15, %16 : vector<8x1xf32>
    %18 = vector.broadcast %17 : vector<8x1xf32> to vector<8x32xf32>
    %19 = arith.subf %13, %18 : vector<8x32xf32>
    %20 = arith.mulf %19, %19 : vector<8x32xf32>
    %cst_13 = arith.constant dense<0.000000e+00> : vector<8xf32>
    %21 = vector.multi_reduction <add>, %20, %cst_13 [1] : vector<8x32xf32> to vector<8xf32>
    %22 = vector.shape_cast %21 : vector<8xf32> to vector<8x1xf32>
    %cst_14 = arith.constant 3.200000e+01 : f32
    %23 = vector.broadcast %cst_14 : f32 to vector<8x1xf32>
    %24 = arith.divf %22, %23 : vector<8x1xf32>
    %25 = vector.broadcast %17 : vector<8x1xf32> to vector<8x32xf32>
    %26 = arith.subf %13, %25 : vector<8x32xf32>
    %cst_15 = arith.constant 9.99999974E-6 : f32
    %27 = vector.broadcast %cst_15 : f32 to vector<8x1xf32>
    %28 = arith.addf %24, %27 : vector<8x1xf32>
    %29 = math.rsqrt %28 : vector<8x1xf32>
    %30 = vector.broadcast %29 : vector<8x1xf32> to vector<8x32xf32>
    %31 = arith.mulf %26, %30 : vector<8x32xf32>
    %c0_16 = arith.constant 0 : index
    %c0_17 = arith.constant 0 : index
    %32 = vector.load %arg6[%c0_16, %c0_17] : memref<1x32xf32, #tpu.memory_space<vmem>>, vector<1x32xf32>
    %33 = vector.broadcast %32 : vector<1x32xf32> to vector<8x32xf32>
    %34 = arith.mulf %31, %33 : vector<8x32xf32>
    %c0_18 = arith.constant 0 : index
    %c0_19 = arith.constant 0 : index
    %35 = vector.load %arg7[%c0_18, %c0_19] : memref<1x32xf32, #tpu.memory_space<vmem>>, vector<1x32xf32>
    %36 = vector.broadcast %35 : vector<1x32xf32> to vector<8x32xf32>
    %37 = arith.addf %34, %36 : vector<8x32xf32>
    %c0_20 = arith.constant 0 : index
    %c0_21 = arith.constant 0 : index
    %38 = vector.load %arg8[%c0_20, %c0_21] : memref<8x32xf32, #tpu.memory_space<vmem>>, vector<8x32xf32>
    tpu.vector_store %arg8[%c0_20, %c0_21], %37 {strides = array<i32>} : memref<8x32xf32, #tpu.memory_space<vmem>>, vector<8x32xf32>,
    return
  }
  func.func @transform_0(%arg0: i32) -> (i32, i32) {
    %c0_i32 = arith.constant 0 : i32
    %c0_i32_0 = arith.constant 0 : i32
    return %arg0, %c0_i32 : i32, i32
  }
  func.func @transform_1(%arg0: i32) -> (i32, i32) {
    %c0_i32 = arith.constant 0 : i32
    %c0_i32_0 = arith.constant 0 : i32
    %c0_i32_1 = arith.constant 0 : i32
    return %c0_i32, %c0_i32_0 : i32, i32
  }
  func.func @transform_2(%arg0: i32) -> (i32, i32) {
    %c0_i32 = arith.constant 0 : i32
    %c0_i32_0 = arith.constant 0 : i32
    %c0_i32_1 = arith.constant 0 : i32
    return %c0_i32, %c0_i32_0 : i32, i32
  }
  func.func @transform_3(%arg0: i32) -> (i32, i32) {
    %c0_i32 = arith.constant 0 : i32
    %c0_i32_0 = arith.constant 0 : i32
    %c0_i32_1 = arith.constant 0 : i32
    return %c0_i32, %c0_i32_0 : i32, i32
  }
  func.func @transform_4(%arg0: i32) -> (i32, i32) {
    %c0_i32 = arith.constant 0 : i32
    %c0_i32_0 = arith.constant 0 : i32
    %c0_i32_1 = arith.constant 0 : i32
    return %c0_i32, %c0_i32_0 : i32, i32
  }
  func.func @transform_5(%arg0: i32) -> (i32, i32) {
    %c0_i32 = arith.constant 0 : i32
    %c0_i32_0 = arith.constant 0 : i32
    %c0_i32_1 = arith.constant 0 : i32
    return %c0_i32, %c0_i32_0 : i32, i32
  }
  func.func @transform_6(%arg0: i32) -> (i32, i32) {
    %c0_i32 = arith.constant 0 : i32
    %c0_i32_0 = arith.constant 0 : i32
    %c0_i32_1 = arith.constant 0 : i32
    return %c0_i32, %c0_i32_0 : i32, i32
  }
  func.func @transform_7(%arg0: i32) -> (i32, i32) {
    %c0_i32 = arith.constant 0 : i32
    %c0_i32_0 = arith.constant 0 : i32
    return %arg0, %c0_i32 : i32, i32
  }
}

</mosaic_0001>

<bundles_post_ra>
// kernel: transformer_decoder_forward.18
= control target key start
LH: loop header
LB: loop body
LE: loop exit
PB: predicated region body
PF: predicated region fallthrough
CT: control target
= control target key end

     0   :  { %s543_s21 = smov 0   ;;  %s593_s0 = inlined_call_operand.vmem [shape: f32[16,32], index: 0, kind: input, shape index: {}]   ;;  %s594_s1 = inlined_call_operand.vmem [shape: f32[32,32], index: 1, kind: input, shape index: {}]   ;;  %s595_s2 = inlined_call_operand.vmem [shape: f32[1,32], index: 2, kind: input, shape index: {}]   ;;  %s596_s3 = inlined_call_operand.vmem [shape: f32[16,32], index: 3, kind: input, shape index: {}]   ;;  %s597_s4 = inlined_call_operand.vmem [shape: f32[1,32], index: 4, kind: input, shape index: {}]   ;;  %s598_s5 = inlined_call_operand.vmem [shape: f32[1,32], index: 5, kind: input, shape index: {}]   ;;  %s599_s6 = inlined_call_operand.vmem [shape: f32[16,32], index: 6, kind: output, shape index: {}]  }
   0x1 LB: > { %s448_s22 = sadd.s32 4294967295, %s503_s21   ;;  %p452_p0 = scmp.ge.s32.totalorder %s503_s21, 1  ;;  %s503_s21 = sphi %s543_s21, %s16_s21  }
   0x2   : > { %p220_p1 = scmp.lt.s32.totalorder %s503_s21, 3 }
   0x4   : > { %p221_p2 = pnand %p452_p0, %p220_p1 }
   0x5   : > { %v265_v0 = vld [vmem:[%s594_s1] sm:$0xff] (!%p221_p2)  ;;  %v266_v1 = vld [vmem:[%s594_s1 + $0x8] sm:$0xff] (!%p221_p2)  ;;  %v267_v2 = vld [vmem:[%s594_s1 + $0x10] sm:$0xff] (!%p221_p2)  ;;  %v505_v3 = vmov (!%p221_p2), 0.0|0.0   ;;  %vm506_vm0 = vmmov (!%p221_p2), 0   ;;  %v507_v6 = vmov (!%p221_p2), 0.0  }
   0x6   : > { %224 = sbr.rel (%p221_p2) target bundleno = 547 (0x223), region = 44  ;;  %478 = vmatprep.subr.bf16.mxu0 (!%p221_p2), %v505_v3  ;;  %v479_v4 = vpack.c.bf16 (!%p221_p2), %v266_v1, %v265_v0  ;;  %v268_v5 = vld [vmem:[%s594_s1 + $0x18] sm:$0xff] (!%p221_p2)  ;;  %475 = vmatprep.mubr.msk.f32.mxu0 (!%p221_p2), %vm506_vm0, %v507_v6  ;;  %p252_p3 = scmp.lt.s32.totalorder (!%p221_p2), %s448_s22, 1  ;;  %vm276_vm1 = vcmask (!%p221_p2), 261120   ;;  %v456_v9 = vld [vmem:[%s595_s2] ss:$0 sm:$0xff] (!%p221_p2) }
   0x7   : > { %v482_v7 = vpack.c.bf16 (!%p221_p2), %v268_v5, %v267_v2  ;;  %v458_v25 = vld [vmem:[%s597_s4] ss:$0 sm:$0xff] (!%p221_p2) }
   0x8   : > { %480 = vmatpush3.bf16.msra.mxu0 (!%p221_p2), %v479_v4  ;;  %v459_v27 = vld [vmem:[%s598_s5] ss:$0 sm:$0xff] (!%p221_p2) }
   0x9   : > { %481 = vmatprep.subr.bf16.mxu0 (!%p221_p2), %v505_v3 }
   0xc   : > { %483 = vmatpush3.bf16.msra.mxu0 (!%p221_p2), %v482_v7 }
   0xd   : > { %s601_s22 = smov (!%p252_p3, %s448_s22), 1 }
   0xe   : > { %s563_s7 = sshll.u32 %s601_s22, 3 }
   0xf   : > { %s255_s10 = scalar_lea.vmem %s593_s0, %s563_s7  ;;  %s259_s13 = scalar_lea.vmem %s596_s3, %s563_s7 }
  0x10   : > { %v264_v8 = vld [vmem:[%s255_s10] sm:$0xff]  ;;  %s263_s23 = scalar_lea.vmem %s599_s6, %s563_s7 }
  0x11   : > { %476 = vmatmul.mubr.msk.f32.vlgmr.msra.gmra.mrb[0].mxu0 %vm276_vm1, %v264_v8  ;;  %v350_v11 = vld [vmem:[%s259_s13] sm:$0xff] }
  0xe4   : > { %v346_v10 = vpop.f32.mrb[0].mxu0 }
  0xe5   : > { %v347_v12 = vadd.f32 %v456_v9, %v346_v10  ;;  %v477_v13 = vpop.f32.mrb[1].mxu0 }
  0xe7   : > { %v351_v14 = vadd.f32 %v350_v11, %v347_v12 }
  0xe9   : > { %v352_v15 = vsel %vm276_vm1, %v351_v14, 0.0 }
  0xea   : > { %353 = vadd.xlane.f32.xlu0 %v352_v15 }
 0x177   : > { %v354_v16 = vpop.xlane.xlu0 %353 }
 0x178   : > { %v356_v17 = vmul.f32 0.03125, %v354_v16 }
 0x17a   : > { %v357_v18 = vsub.f32 %v351_v14, %v356_v17 }
 0x17c   : > { %v358_v19 = vmul.f32 %v357_v18, %v357_v18 }
 0x17e   : > { %v359_v20 = vsel %vm276_vm1, %v358_v19, 0.0 }
 0x17f   : > { %360 = vadd.xlane.f32.xlu0 %v359_v20 }
 0x20c   : > { %v361_v21 = vpop.xlane.xlu0 %360 }
 0x20d   : > { %v362_v22 = vmul.f32 0.03125, %v361_v21 }
 0x20f   : > { %v363_v23 = vadd.f32 1e-05, %v362_v22 }
 0x211   : > { %495 = vrsqrt.f32 %v363_v23 }
 0x21b   : > { %v496_v24 = vpop.eup %495 }
 0x21c   : > { %v365_v26 = vmul.f32 %v496_v24, %v357_v18 }
 0x21e   : > { %v373_v28 = vmul.f32 %v458_v25, %v365_v26 }
 0x220   : > { %v381_v29 = vadd.f32 %v459_v27, %v373_v28 }
 0x222   : > { %382 = vst.msk [vmem:[%s263_s23] sm:$0xff] %vm276_vm1, %v381_v29 }
 0x223 PF: > { %s16_s21 = sadd.s32 1, %s503_s21  }
 0x224   : > { %p13_p4 = scmp.ge.s32.totalorder %s16_s21, 4  }
 0x226   :  { %15 = sbr.rel (!%p13_p4) target bundleno = 1 (0x1), region = 77 }

// kernel: transformer_decoder_forward.16
= control target key start
LH: loop header
LB: loop body
LE: loop exit
PB: predicated region body
PF: predicated region fallthrough
CT: control target
= control target key end

     0   :  { %s543_s18 = smov 0   ;;  %s585_s0 = inlined_call_operand.vmem [shape: f32[16,32], index: 0, kind: input, shape index: {}]   ;;  %s586_s1 = inlined_call_operand.vmem [shape: f32[32,96], index: 1, kind: input, shape index: {}]   ;;  %s587_s2 = inlined_call_operand.vmem [shape: f32[1,96], index: 2, kind: input, shape index: {}]   ;;  %s588_s3 = inlined_call_operand.vmem [shape: f32[16,32], index: 3, kind: output, shape index: {0}]   ;;  %s589_s4 = inlined_call_operand.vmem [shape: f32[16,32], index: 4, kind: output, shape index: {1}]   ;;  %s590_s5 = inlined_call_operand.vmem [shape: f32[16,32], index: 5, kind: output, shape index: {2}]  }
   0x1 LB: > { %s452_s19 = sadd.s32 4294967295, %s506_s18   ;;  %p456_p0 = scmp.ge.s32.totalorder %s506_s18, 1  ;;  %s506_s18 = sphi %s543_s18, %s16_s18  }
   0x2   : > { %p191_p1 = scmp.lt.s32.totalorder %s506_s18, 3 }
   0x4   : > { %p192_p2 = pnand %p456_p0, %p191_p1 }
   0x5   : > { %v242_v0 = vld [vmem:[%s586_s1] sm:$0xff] (!%p192_p2)  ;;  %v243_v1 = vld [vmem:[%s586_s1 + $0x8] sm:$0xff] (!%p192_p2)  ;;  %v244_v2 = vld [vmem:[%s586_s1 + $0x10] sm:$0xff] (!%p192_p2)  ;;  %v508_v3 = vmov (!%p192_p2), 0.0|0.0   ;;  %vm509_vm0 = vmmov (!%p192_p2), 0   ;;  %v510_v6 = vmov (!%p192_p2), 0.0  }
   0x6   : > { %195 = sbr.rel (%p192_p2) target bundleno = 351 (0x15f), region = 32  ;;  %481 = vmatprep.subr.bf16.mxu0 (!%p192_p2), %v508_v3  ;;  %v482_v4 = vpack.c.bf16 (!%p192_p2), %v243_v1, %v242_v0  ;;  %v245_v5 = vld [vmem:[%s586_s1 + $0x18] sm:$0xff] (!%p192_p2)  ;;  %478 = vmatprep.mubr.msk.f32.mxu0 (!%p192_p2), %vm509_vm0, %v510_v6  ;;  %p225_p3 = scmp.lt.s32.totalorder (!%p192_p2), %s452_s19, 1  ;;  %vm253_vm1 = vcmask (!%p192_p2), 261120   ;;  %v461_v9 = vld [vmem:[%s587_s2] ss:$0 sm:$0xff] (!%p192_p2) }
   0x7   : > { %v485_v7 = vpack.c.bf16 (!%p192_p2), %v245_v5, %v244_v2  ;;  %s511_s12 = smov (!%p192_p2), 96   ;;  %s512_s13 = smov (!%p192_p2), 64  }
   0x8   : > { %483 = vmatpush3.bf16.msra.mxu0 (!%p192_p2), %v482_v4 }
   0x9   : > { %484 = vmatprep.subr.bf16.mxu0 (!%p192_p2), %v508_v3 }
   0xc   : > { %486 = vmatpush3.bf16.msra.mxu0 (!%p192_p2), %v485_v7 }
   0xd   : > { %s592_s19 = smov (!%p225_p3, %s452_s19), 1 }
   0xe   : > { %s457_s28 = sshll.u32 %s592_s19, 3 }
   0xf   : > { %s228_s6 = scalar_lea.vmem %s585_s0, %s457_s28  ;;  %s232_s11 = scalar_lea.vmem %s588_s3, %s457_s28 }
  0x10   : > { %v241_v8 = vld [vmem:[%s228_s6] sm:$0xff]  ;;  %s236_s16 = scalar_lea.vmem %s589_s4, %s457_s28  ;;  %s240_s20 = scalar_lea.vmem %s590_s5, %s457_s28 }
  0x11   : > { %479 = vmatmul.mubr.msk.f32.vlgmr.msra.gmra.mrb[0].mxu0 %vm253_vm1, %v241_v8 }
  0xe4   : > { %v323_v10 = vpop.f32.mrb[0].mxu0 }
  0xe5   : > { %v324_v11 = vadd.f32 %v461_v9, %v323_v10  ;;  %v480_v12 = vpop.f32.mrb[1].mxu0 }
  0xe7   : > { %327 = vst.msk [vmem:[%s232_s11] sm:$0xff] %vm253_vm1, %v324_v11  ;;  %329 = vrot.lane.b32.xlu0 %v324_v11, %s511_s12 }
  0xeb   : > { %333 = vrot.lane.b32.xlu0 %v324_v11, %s512_s13 }
 0x159   : > { %v330_v13 = vpop.permute.xlu0 %329 }
 0x15a   : > { %332 = vst.msk [vmem:[%s236_s16] sm:$0xff] %vm253_vm1, %v330_v13 }
 0x15d   : > { %v334_v14 = vpop.permute.xlu0 %333 }
 0x15e   : > { %336 = vst.msk [vmem:[%s240_s20] sm:$0xff] %vm253_vm1, %v334_v14 }
 0x15f PF: > { %s16_s18 = sadd.s32 1, %s506_s18  }
 0x160   : > { %p13_p4 = scmp.ge.s32.totalorder %s16_s18, 4  }
 0x162   :  { %15 = sbr.rel (!%p13_p4) target bundleno = 1 (0x1), region = 86 }

// kernel: transformer_decoder_forward.19
= control target key start
LH: loop header
LB: loop body
LE: loop exit
PB: predicated region body
PF: predicated region fallthrough
CT: control target
= control target key end

     0   :  { %s381_s12 = smov 0   ;;  %s413_s0 = inlined_call_operand.vmem [shape: f32[16,32], index: 0, kind: input, shape index: {}]   ;;  %s414_s1 = inlined_call_operand.vmem [shape: f32[32,32], index: 1, kind: input, shape index: {}]   ;;  %s415_s2 = inlined_call_operand.vmem [shape: f32[1,32], index: 2, kind: input, shape index: {}]   ;;  %s416_s3 = inlined_call_operand.vmem [shape: f32[16,32], index: 3, kind: output, shape index: {}]  }
   0x1 LB: > { %s306_s13 = sadd.s32 4294967295, %s356_s12   ;;  %p310_p0 = scmp.ge.s32.totalorder %s356_s12, 1  ;;  %s356_s12 = sphi %s381_s12, %s13_s12  }
   0x2   : > { %p136_p1 = scmp.lt.s32.totalorder %s356_s12, 3 }
   0x4   : > { %p137_p2 = pnand %p310_p0, %p136_p1 }
   0x5   : > { %v167_v0 = vld [vmem:[%s414_s1] sm:$0xff] (!%p137_p2)  ;;  %v168_v1 = vld [vmem:[%s414_s1 + $0x8] sm:$0xff] (!%p137_p2)  ;;  %v169_v2 = vld [vmem:[%s414_s1 + $0x10] sm:$0xff] (!%p137_p2)  ;;  %v358_v3 = vmov (!%p137_p2), 0.0|0.0   ;;  %vm359_vm0 = vmmov (!%p137_p2), 0   ;;  %v360_v6 = vmov (!%p137_p2), 0.0  }
   0x6   : > { %140 = sbr.rel (%p137_p2) target bundleno = 232 (0xe8), region = 32  ;;  %333 = vmatprep.subr.bf16.mxu0 (!%p137_p2), %v358_v3  ;;  %v334_v4 = vpack.c.bf16 (!%p137_p2), %v168_v1, %v167_v0  ;;  %v170_v5 = vld [vmem:[%s414_s1 + $0x18] sm:$0xff] (!%p137_p2)  ;;  %330 = vmatprep.mubr.msk.f32.mxu0 (!%p137_p2), %vm359_vm0, %v360_v6  ;;  %p158_p3 = scmp.lt.s32.totalorder (!%p137_p2), %s306_s13, 1  ;;  %vm178_vm1 = vcmask (!%p137_p2), 261120   ;;  %v313_v9 = vld [vmem:[%s415_s2] ss:$0 sm:$0xff] (!%p137_p2) }
   0x7   : > { %v337_v7 = vpack.c.bf16 (!%p137_p2), %v170_v5, %v169_v2 }
   0x8   : > { %335 = vmatpush3.bf16.msra.mxu0 (!%p137_p2), %v334_v4 }
   0x9   : > { %336 = vmatprep.subr.bf16.mxu0 (!%p137_p2), %v358_v3 }
   0xc   : > { %338 = vmatpush3.bf16.msra.mxu0 (!%p137_p2), %v337_v7 }
   0xd   : > { %s418_s13 = smov (!%p158_p3, %s306_s13), 1 }
   0xe   : > { %s311_s22 = sshll.u32 %s418_s13, 3 }
   0xf   : > { %s161_s25 = scalar_lea.vmem %s413_s0, %s311_s22  ;;  %s165_s30 = scalar_lea.vmem %s416_s3, %s311_s22 }
  0x10   : > { %v166_v8 = vld [vmem:[%s161_s25] sm:$0xff] }
  0x11   : > { %331 = vmatmul.mubr.msk.f32.vlgmr.msra.gmra.mrb[0].mxu0 %vm178_vm1, %v166_v8 }
  0xe4   : > { %v248_v10 = vpop.f32.mrb[0].mxu0 }
  0xe5   : > { %v249_v11 = vadd.f32 %v313_v9, %v248_v10  ;;  %v332_v12 = vpop.f32.mrb[1].mxu0 }
  0xe7   : > { %252 = vst.msk [vmem:[%s165_s30] sm:$0xff] %vm178_vm1, %v249_v11 }
  0xe8 PF: > { %s13_s12 = sadd.s32 1, %s356_s12  }
  0xe9   : > { %p10_p4 = scmp.ge.s32.totalorder %s13_s12, 4  }
  0xeb   :  { %12 = sbr.rel (!%p10_p4) target bundleno = 1 (0x1), region = 62 }

// kernel: transformer_decoder_forward.17
= control target key start
LH: loop header
LB: loop body
LE: loop exit
PB: predicated region body
PF: predicated region fallthrough
CT: control target
= control target key end

     0   :  { %s1175_s15 = smov 0   ;;  %s1285_s0 = inlined_call_operand.vmem [shape: f32[2,8,32], index: 0, kind: input, shape index: {}]   ;;  %s1286_s1 = inlined_call_operand.vmem [shape: f32[2,8,32], index: 1, kind: input, shape index: {}]   ;;  %s1287_s2 = inlined_call_operand.vmem [shape: f32[2,8,32], index: 2, kind: input, shape index: {}]   ;;  %s1288_s3 = inlined_call_operand.vmem [shape: f32[2,8,8], index: 3, kind: input, shape index: {}]   ;;  %s1289_s4 = inlined_call_operand.vmem [shape: f32[2,8,32], index: 4, kind: output, shape index: {}]  }
   0x1 LB: > { %s1022_s16 = sadd.s32 4294967295, %s1140_s15   ;;  %p1026_p0 = scmp.ge.s32.totalorder %s1140_s15, 1  ;;  %s1140_s15 = sphi %s1175_s15, %s14_s15  }
   0x2   : > { %p188_p1 = scmp.lt.s32.totalorder %s1140_s15, 3 }
   0x4   : > { %p189_p2 = pnand %p1026_p0, %p188_p1 }
   0x5   : > { %p224_p3 = scmp.lt.s32.totalorder (!%p189_p2), %s1022_s16, 1  ;;  %v1142_v0 = vmov (!%p189_p2), 0.0   ;;  %vm1143_vm0 = vmmov (!%p189_p2), 0   ;;  %vm248_vm1 = vcmask (!%p189_p2), 64512   ;;  %s1144_s27 = smov (!%p189_p2), 120   ;;  %vm585_vm3 = vcmask (!%p189_p2), 130112  }
   0x6   : > { %192 = sbr.rel (%p189_p2) target bundleno = 1463 (0x5b7), region = 36  ;;  %1062 = vmatprep.subr.mxu0 (!%p189_p2), %v1142_v0  ;;  %1064 = vmatprep.mubr.msk.f32.mxu0 (!%p189_p2), %vm1143_vm0, %v1142_v0  ;;  %s1145_s28 = smov (!%p189_p2), 112   ;;  %vm758_vm4 = vcmask (!%p189_p2), 195712   ;;  %vm931_vm5 = vcmask (!%p189_p2), 261312  }
   0x7   : > { %1067 = vmatprep.subr.mxu1 (!%p189_p2), %v1142_v0  ;;  %1069 = vmatprep.mubr.msk.f32.mxu1 (!%p189_p2), %vm1143_vm0, %v1142_v0  ;;  %s1146_s29 = smov (!%p189_p2), 104   ;;  %s1147_s10 = smov (!%p189_p2), 8  }
   0x8   : > { %s1148_s11 = smov (!%p189_p2), 16   ;;  %s1149_s12 = smov (!%p189_p2), 24  }
   0xd   : > { %s1291_s16 = smov (!%p224_p3, %s1022_s16), 1 }
   0xe   : > { %s1189_s17 = sshll.u32 %s1291_s16, 3 }
   0xf   : > { %s231_s20 = scalar_lea.vmem %s1286_s1, %s1189_s17  ;;  %s227_s23 = scalar_lea.vmem %s1285_s0, %s1189_s17 }
  0x10   : > { %v246_v1 = vld [vmem:[%s231_s20] sm:$0xff]  ;;  %s239_s26 = scalar_lea.vmem %s1288_s3, %s1189_s17  ;;  %s235_s6 = scalar_lea.vmem %s1287_s2, %s1189_s17 }
  0x11   : > { %1063 = vmatpush3.xpose.msk.msra.mxu0 %vm248_vm1, %v246_v1  ;;  %v245_v2 = vld [vmem:[%s227_s23] sm:$0xff]  ;;  %415 = vrot.lane.b32.xlu1 %v246_v1, %s1144_s27  ;;  %s1248_s9 = scalar_lea.vmem %s1289_s4, %s1189_s17 }
  0x12   : > { %1077 = vmatprep.subr.mxu0 %v1142_v0  ;;  %v1208_v3 = vld [vmem:[%s239_s26] sm:$0xff] }
  0x13   : > { %vm326_vm2 = vcmp.gt.f32.partialorder %v1208_v3, 0.0  ;;  %v1224_v14 = vld [vmem:[%s235_s6] sm:$0xff] }
  0x14   : > { %1065 = vmatmul.mubr.msk.f32.vlgmr.msra.gmra.mrb[0].mxu0 %vm248_vm1, %v245_v2  ;;  %1068 = vmatpush3.msra.mxu1 %v1224_v14 }
  0x15   : > { %1079 = vmatprep.mubr.msk.f32.mxu0 %vm1143_vm0, %v1142_v0  ;;  %413 = vrot.lane.b32.xlu1 %v245_v2, %s1144_s27 }
  0x16   : > { %1072 = vmatprep.subr.mxu1 %v1142_v0 }
  0x19   : > { %587 = vrot.lane.b32.xlu1 %v245_v2, %s1145_s28 }
  0x1d   : > { %762 = vrot.lane.b32.xlu1 %v246_v1, %s1146_s29 }
  0x21   : > { %760 = vrot.lane.b32.xlu1 %v245_v2, %s1146_s29 }
  0x83   : > { %v416_v15 = vpop.permute.xlu1 %415 }
  0x87   : > { %v414_v17 = vpop.permute.xlu1 %413 }
  0x8b   : > { %v588_v19 = vpop.permute.xlu1 %587 }
  0x8f   : > { %v763_v22 = vpop.permute.xlu1 %762 }
  0x93   : > { %v761_v23 = vpop.permute.xlu1 %760 }
  0xe7   : > { %v321_v4 = vpop.f32.mrb[0].mxu0 }
  0xe8   : > { %v325_v5 = vmul.f32 0.35355338, %v321_v4  ;;  %v1066_v6 = vpop.f32.mrb[1].mxu0 }
  0xea   : > { %v327_v7 = vsel %vm326_vm2, %v325_v5, -1e+09 }
  0xeb   : > { %v328_v8 = vsel %vm248_vm1, %v327_v7, -inf }
  0xec   : > { %329 = vmax.xlane.f32.xlu0 %v328_v8 }
 0x179   : > { %v330_v9 = vpop.xlane.xlu0 %329 }
 0x17a   : > { %v331_v10 = vsub.f32 %v327_v7, %v330_v9 }
 0x17c   : > { %v332_v11 = vmul.f32 1.442695, %v331_v10 }
 0x17e   : > { %1118 = vpow2.f32 %v332_v11 }
 0x188   : > { %v1119_v12 = vpop.eup %1118 }
 0x189   : > { %v334_v13 = vsel %vm248_vm1, %v1119_v12, 0.0 }
 0x18a   : > { %335 = vadd.xlane.f32.xlu0 %v334_v13 }
 0x1a0   : > { %589 = vrot.lane.b32.xlu0 %v246_v1, %s1145_s28 }
 0x217   : > { %v336_v16 = vpop.xlane.xlu0 %335 }
 0x218   : > { %1120 = vrcp.f32 %v336_v16 }
 0x21b   : > { %v590_v21 = vpop.permute.xlu0 %589 }
 0x222   : > { %v1121_v18 = vpop.eup %1120 }
 0x223   : > { %v338_v20 = vmul.f32 %v1121_v18, %v1119_v12 }
 0x225   : > { %1070 = vmatmul.mubr.msk.f32.vlgmr.msra.gmra.mrb[0].mxu1 %vm248_vm1, %v338_v20 }
 0x226   : > { %1073 = vmatpush3.xpose.msk.msra.mxu1 %vm248_vm1, %v416_v15  ;;  %1074 = vmatprep.mubr.msk.f32.mxu1 %vm1143_vm0, %v1142_v0 }
 0x227   : > { %1082 = vmatprep.subr.mxu1 %v1142_v0 }
 0x229   : > { %1075 = vmatmul.mubr.msk.f32.vlgmr.msra.gmra.mrb[2].mxu1 %vm248_vm1, %v414_v17 }
 0x22a   : > { %1083 = vmatpush3.xpose.msk.msra.mxu1 %vm248_vm1, %v590_v21  ;;  %1084 = vmatprep.mubr.msk.f32.mxu1 %vm1143_vm0, %v1142_v0 }
 0x22b   : > { %1092 = vmatprep.subr.mxu1 %v1142_v0 }
 0x22d   : > { %1085 = vmatmul.mubr.msk.f32.vlgmr.msra.gmra.mrb[4].mxu1 %vm248_vm1, %v588_v19 }
 0x22e   : > { %1093 = vmatpush3.xpose.msk.msra.mxu1 %vm248_vm1, %v763_v22  ;;  %1094 = vmatprep.mubr.msk.f32.mxu1 %vm1143_vm0, %v1142_v0 }
 0x231   : > { %1095 = vmatmul.mubr.msk.f32.vlgmr.msra.gmra.mrb[6].mxu1 %vm248_vm1, %v761_v23 }
 0x2f8   : > { %v408_v24 = vpop.f32.mrb[0].mxu1 }
 0x2f9   : > { %412 = vst.msk [vmem:[%s1248_s9] sm:$0xff] %vm248_vm1, %v408_v24  ;;  %v1071_v25 = vpop.f32.mrb[1].mxu1 }
 0x2fc   : > { %v487_v26 = vpop.f32.mrb[2].mxu1 }
 0x2fd   : > { %v491_v27 = vmul.f32 0.35355338, %v487_v26  ;;  %v1076_v28 = vpop.f32.mrb[3].mxu1 }
 0x2ff   : > { %v492_v29 = vsel %vm326_vm2, %v491_v27, -1e+09 }
 0x300   : > { %v661_v30 = vpop.f32.mrb[4].mxu1  ;;  %v493_v31 = vsel %vm248_vm1, %v492_v29, -inf }
 0x301   : > { %v665_v32 = vmul.f32 0.35355338, %v661_v30  ;;  %494 = vmax.xlane.f32.xlu1 %v493_v31  ;;  %v1086_v33 = vpop.f32.mrb[5].mxu1 }
 0x303   : > { %v666_v34 = vsel %vm326_vm2, %v665_v32, -1e+09 }
 0x304   : > { %v834_v35 = vpop.f32.mrb[6].mxu1  ;;  %v667_v36 = vsel %vm248_vm1, %v666_v34, -inf }
 0x305   : > { %v838_v37 = vmul.f32 0.35355338, %v834_v35  ;;  %668 = vmax.xlane.f32.xlu0 %v667_v36  ;;  %v1096_v38 = vpop.f32.mrb[7].mxu1 }
 0x307   : > { %v839_v39 = vsel %vm326_vm2, %v838_v37, -1e+09 }
 0x308   : > { %v840_v40 = vsel %vm248_vm1, %v839_v39, -inf }
 0x309   : > { %841 = vmax.xlane.f32.xlu1 %v840_v40 }
 0x38e   : > { %v495_v41 = vpop.xlane.xlu1 %494 }
 0x38f   : > { %v496_v42 = vsub.f32 %v492_v29, %v495_v41 }
 0x391   : > { %v497_v43 = vmul.f32 1.442695, %v496_v42 }
 0x392   : > { %v669_v44 = vpop.xlane.xlu0 %668 }
 0x393   : > { %1122 = vpow2.f32 %v497_v43  ;;  %v670_v45 = vsub.f32 %v666_v34, %v669_v44 }
 0x395   : > { %v671_v46 = vmul.f32 1.442695, %v670_v45 }
 0x396   : > { %v842_v51 = vpop.xlane.xlu1 %841 }
 0x397   : > { %1124 = vpow2.f32 %v671_v46  ;;  %v843_v52 = vsub.f32 %v839_v39, %v842_v51 }
 0x399   : > { %v844_v53 = vmul.f32 1.442695, %v843_v52 }
 0x39b   : > { %1126 = vpow2.f32 %v844_v53 }
 0x39d   : > { %v1123_v47 = vpop.eup %1122 }
 0x39e   : > { %v499_v48 = vsel %vm248_vm1, %v1123_v47, 0.0 }
 0x39f   : > { %500 = vadd.xlane.f32.xlu1 %v499_v48 }
 0x3a1   : > { %v1125_v49 = vpop.eup %1124 }
 0x3a2   : > { %v673_v50 = vsel %vm248_vm1, %v1125_v49, 0.0 }
 0x3a3   : > { %674 = vadd.xlane.f32.xlu0 %v673_v50 }
 0x3a5   : > { %v1127_v54 = vpop.eup %1126 }
 0x3a6   : > { %v846_v55 = vsel %vm248_vm1, %v1127_v54, 0.0 }
 0x3b0   : > { %678 = vrot.lane.b32.xlu1 %v1224_v14, %s1145_s28 }
 0x3b9   : > { %505 = vrot.lane.b32.xlu0 %v1224_v14, %s1144_s27 }
 0x3d4   : > { %847 = vadd.xlane.f32.xlu1 %v846_v55 }
 0x3e5   : > { %851 = vrot.lane.b32.xlu1 %v1224_v14, %s1146_s29 }
 0x42c   : > { %v501_v56 = vpop.xlane.xlu1 %500 }
 0x42d   : > { %1128 = vrcp.f32 %v501_v56 }
 0x430   : > { %v675_v57 = vpop.xlane.xlu0 %674  ;;  %v679_v61 = vpop.permute.xlu1 %678 }
 0x431   : > { %1130 = vrcp.f32 %v675_v57 }
 0x434   : > { %v506_v58 = vpop.permute.xlu0 %505 }
 0x435   : > { %1078 = vmatpush3.msra.mxu0 %v506_v58 }
 0x436   : > { %1087 = vmatprep.subr.mxu0 %v1142_v0 }
 0x437   : > { %v1129_v59 = vpop.eup %1128 }
 0x438   : > { %v503_v60 = vmul.f32 %v1129_v59, %v1123_v47 }
 0x43a   : > { %1080 = vmatmul.mubr.msk.f32.vlgmr.msra.gmra.mrb[2].mxu0 %vm248_vm1, %v503_v60 }
 0x43b   : > { %v1131_v62 = vpop.eup %1130  ;;  %1088 = vmatpush3.msra.mxu0 %v679_v61  ;;  %1089 = vmatprep.mubr.msk.f32.mxu0 %vm1143_vm0, %v1142_v0 }
 0x43c   : > { %v677_v63 = vmul.f32 %v1131_v62, %v1125_v49  ;;  %1097 = vmatprep.subr.mxu0 %v1142_v0 }
 0x43e   : > { %1090 = vmatmul.mubr.msk.f32.vlgmr.msra.gmra.mrb[4].mxu0 %vm248_vm1, %v677_v63 }
 0x43f   : > { %1099 = vmatprep.mubr.msk.f32.mxu0 %vm1143_vm0, %v1142_v0 }
 0x461   : > { %v848_v1 = vpop.xlane.xlu1 %847 }
 0x462   : > { %1132 = vrcp.f32 %v848_v1 }
 0x465   : > { %v852_v2 = vpop.permute.xlu1 %851 }
 0x466   : > { %1098 = vmatpush3.msra.mxu0 %v852_v2 }
 0x46c   : > { %v1133_v3 = vpop.eup %1132 }
 0x46d   : > { %v850_v4 = vmul.f32 %v1133_v3, %v1127_v54 }
 0x46f   : > { %1100 = vmatmul.mubr.msk.f32.vlgmr.msra.gmra.mrb[6].mxu0 %vm248_vm1, %v850_v4 }
 0x50d   : > { %v577_v5 = vpop.f32.mrb[2].mxu0 }
 0x50e   : > { %582 = vrot.lane.b32.xlu0 %v577_v5, %s1147_s10  ;;  %v1081_v6 = vpop.f32.mrb[3].mxu0 }
 0x511   : > { %v750_v7 = vpop.f32.mrb[4].mxu0 }
 0x512   : > { %755 = vrot.lane.b32.xlu1 %v750_v7, %s1148_s11  ;;  %v1091_v8 = vpop.f32.mrb[5].mxu0 }
 0x542   : > { %v923_v0 = vpop.f32.mrb[6].mxu0 }
 0x543   : > { %928 = vrot.lane.b32.xlu0 %v923_v0, %s1149_s12  ;;  %v1101_v9 = vpop.f32.mrb[7].mxu0 }
 0x580   : > { %v583_v10 = vpop.permute.xlu0 %582 }
 0x581   : > { %586 = vst.msk [vmem:[%s1248_s9] sm:$0xff] %vm585_vm3, %v583_v10 }
 0x584   : > { %v756_v11 = vpop.permute.xlu1 %755 }
 0x585   : > { %759 = vst.msk [vmem:[%s1248_s9] sm:$0xff] %vm758_vm4, %v756_v11 }
 0x5b5   : > { %v929_v12 = vpop.permute.xlu0 %928 }
 0x5b6   : > { %932 = vst.msk [vmem:[%s1248_s9] sm:$0xff] %vm931_vm5, %v929_v12 }
 0x5b7 PF: > { %s14_s15 = sadd.s32 1, %s1140_s15  }
 0x5b8   : > { %p11_p4 = scmp.ge.s32.totalorder %s14_s15, 4  }
 0x5ba   :  { %13 = sbr.rel (!%p11_p4) target bundleno = 1 (0x1), region = 75 }

// kernel: transformer_decoder_forward.20
= control target key start
LH: loop header
LB: loop body
LE: loop exit
PB: predicated region body
PF: predicated region fallthrough
CT: control target
= control target key end

     0   :  { %s463_s15 = smov 0   ;;  %s498_s0 = inlined_call_operand.vmem [shape: f32[16,32], index: 0, kind: input, shape index: {}]   ;;  %s499_s1 = inlined_call_operand.vmem [shape: f32[32,64], index: 1, kind: input, shape index: {}]   ;;  %s500_s2 = inlined_call_operand.vmem [shape: f32[1,64], index: 2, kind: input, shape index: {}]   ;;  %s501_s3 = inlined_call_operand.vmem [shape: f32[16,32], index: 3, kind: output, shape index: {0}]   ;;  %s502_s4 = inlined_call_operand.vmem [shape: f32[16,32], index: 4, kind: output, shape index: {1}]  }
   0x1 LB: > { %s380_s16 = sadd.s32 4294967295, %s432_s15   ;;  %p384_p0 = scmp.ge.s32.totalorder %s432_s15, 1  ;;  %s432_s15 = sphi %s463_s15, %s15_s15  }
   0x2   : > { %p164_p1 = scmp.lt.s32.totalorder %s432_s15, 3 }
   0x4   : > { %p165_p2 = pnand %p384_p0, %p164_p1 }
   0x5   : > { %v205_v0 = vld [vmem:[%s499_s1] sm:$0xff] (!%p165_p2)  ;;  %v206_v1 = vld [vmem:[%s499_s1 + $0x8] sm:$0xff] (!%p165_p2)  ;;  %v207_v2 = vld [vmem:[%s499_s1 + $0x10] sm:$0xff] (!%p165_p2)  ;;  %v434_v3 = vmov (!%p165_p2), 0.0|0.0   ;;  %vm435_vm0 = vmmov (!%p165_p2), 0   ;;  %v436_v6 = vmov (!%p165_p2), 0.0  }
   0x6   : > { %168 = sbr.rel (%p165_p2) target bundleno = 347 (0x15b), region = 32  ;;  %408 = vmatprep.subr.bf16.mxu0 (!%p165_p2), %v434_v3  ;;  %v409_v4 = vpack.c.bf16 (!%p165_p2), %v206_v1, %v205_v0  ;;  %v208_v5 = vld [vmem:[%s499_s1 + $0x18] sm:$0xff] (!%p165_p2)  ;;  %405 = vmatprep.mubr.msk.f32.mxu0 (!%p165_p2), %vm435_vm0, %v436_v6  ;;  %p192_p3 = scmp.lt.s32.totalorder (!%p165_p2), %s380_s16, 1  ;;  %vm216_vm1 = vcmask (!%p165_p2), 261120   ;;  %v388_v9 = vld [vmem:[%s500_s2] ss:$0 sm:$0xff] (!%p165_p2) }
   0x7   : > { %v412_v7 = vpack.c.bf16 (!%p165_p2), %v208_v5, %v207_v2  ;;  %s437_s8 = smov (!%p165_p2), 96  }
   0x8   : > { %410 = vmatpush3.bf16.msra.mxu0 (!%p165_p2), %v409_v4 }
   0x9   : > { %411 = vmatprep.subr.bf16.mxu0 (!%p165_p2), %v434_v3 }
   0xc   : > { %413 = vmatpush3.bf16.msra.mxu0 (!%p165_p2), %v412_v7 }
   0xd   : > { %s504_s16 = smov (!%p192_p3, %s380_s16), 1 }
   0xe   : > { %s385_s25 = sshll.u32 %s504_s16, 3 }
   0xf   : > { %s195_s28 = scalar_lea.vmem %s498_s0, %s385_s25  ;;  %s199_s7 = scalar_lea.vmem %s501_s3, %s385_s25 }
  0x10   : > { %v204_v8 = vld [vmem:[%s195_s28] sm:$0xff]  ;;  %s203_s11 = scalar_lea.vmem %s502_s4, %s385_s25 }
  0x11   : > { %406 = vmatmul.mubr.msk.f32.vlgmr.msra.gmra.mrb[0].mxu0 %vm216_vm1, %v204_v8 }
  0xe4   : > { %v286_v10 = vpop.f32.mrb[0].mxu0 }
  0xe5   : > { %v287_v11 = vadd.f32 %v388_v9, %v286_v10  ;;  %v407_v12 = vpop.f32.mrb[1].mxu0 }
  0xe7   : > { %290 = vst.msk [vmem:[%s199_s7] sm:$0xff] %vm216_vm1, %v287_v11  ;;  %292 = vrot.lane.b32.xlu0 %v287_v11, %s437_s8 }
 0x159   : > { %v293_v13 = vpop.permute.xlu0 %292 }
 0x15a   : > { %295 = vst.msk [vmem:[%s203_s11] sm:$0xff] %vm216_vm1, %v293_v13 }
 0x15b PF: > { %s15_s15 = sadd.s32 1, %s432_s15  }
 0x15c   : > { %p12_p4 = scmp.ge.s32.totalorder %s15_s15, 4  }
 0x15e   :  { %14 = sbr.rel (!%p12_p4) target bundleno = 1 (0x1), region = 74 }

// kernel: transformer_decoder_forward.23
= control target key start
LH: loop header
LB: loop body
LE: loop exit
PB: predicated region body
PF: predicated region fallthrough
CT: control target
= control target key end

     0   :  { %s676_s24 = smov 0   ;;  %s752_s0 = inlined_call_operand.vmem [shape: f32[16,32], index: 0, kind: input, shape index: {}]   ;;  %s753_s1 = inlined_call_operand.vmem [shape: f32[32,64], index: 1, kind: input, shape index: {}]   ;;  %s754_s2 = inlined_call_operand.vmem [shape: f32[1,64], index: 2, kind: input, shape index: {}]   ;;  %s755_s3 = inlined_call_operand.vmem [shape: f32[64,32], index: 3, kind: input, shape index: {}]   ;;  %s756_s4 = inlined_call_operand.vmem [shape: f32[1,32], index: 4, kind: input, shape index: {}]   ;;  %s757_s5 = inlined_call_operand.vmem [shape: f32[1,32], index: 5, kind: input, shape index: {}]   ;;  %s758_s6 = inlined_call_operand.vmem [shape: f32[1,32], index: 6, kind: input, shape index: {}]   ;;  %s759_s7 = inlined_call_operand.vmem [shape: f32[16,32], index: 7, kind: output, shape index: {}]  }
   0x1 LB: > { %s535_s25 = sadd.s32 4294967295, %s631_s24   ;;  %p539_p0 = scmp.ge.s32.totalorder %s631_s24, 1  ;;  %s631_s24 = sphi %s676_s24, %s17_s24  }
   0x2   : > { %p236_p1 = scmp.lt.s32.totalorder %s631_s24, 3 }
   0x4   : > { %p237_p2 = pnand %p539_p0, %p236_p1 }
   0x5   : > { %v275_v0 = vld [vmem:[%s753_s1] sm:$0xff] (!%p237_p2)  ;;  %v276_v1 = vld [vmem:[%s753_s1 + $0x8] sm:$0xff] (!%p237_p2)  ;;  %v277_v2 = vld [vmem:[%s753_s1 + $0x10] sm:$0xff] (!%p237_p2)  ;;  %v633_v3 = vmov (!%p237_p2), 0.0|0.0   ;;  %vm634_vm0 = vmmov (!%p237_p2), 0   ;;  %v635_v6 = vmov (!%p237_p2), 0.0  }
   0x6   : > { %240 = sbr.rel (%p237_p2) target bundleno = 763 (0x2fb), region = 48  ;;  %594 = vmatprep.subr.bf16.mxu0 (!%p237_p2), %v633_v3  ;;  %v595_v4 = vpack.c.bf16 (!%p237_p2), %v276_v1, %v275_v0  ;;  %v278_v5 = vld [vmem:[%s753_s1 + $0x18] sm:$0xff] (!%p237_p2)  ;;  %572 = vmatprep.mubr.msk.f32.mxu0 (!%p237_p2), %vm634_vm0, %v635_v6  ;;  %p266_p3 = scmp.lt.s32.totalorder (!%p237_p2), %s535_s25, 1  ;;  %v361_v7 = vld [vmem:[%s755_s3] sm:$0xff] (!%p237_p2)  ;;  %v362_v8 = vld [vmem:[%s755_s3 + $0x8] sm:$0xff] (!%p237_p2)  ;;  %vm286_vm1 = vcmask (!%p237_p2), 261120  }
   0x7   : > { %600 = vmatprep.subr.bf16.mxu1 (!%p237_p2), %v633_v3  ;;  %v601_v9 = vpack.c.bf16 (!%p237_p2), %v362_v8, %v361_v7  ;;  %v363_v10 = vld [vmem:[%s755_s3 + $0x10] sm:$0xff] (!%p237_p2)  ;;  %v364_v11 = vld [vmem:[%s755_s3 + $0x18] sm:$0xff] (!%p237_p2)  ;;  %591 = vmatprep.mubr.msk.f32.mxu1 (!%p237_p2), %vm634_vm0, %v635_v6  ;;  %v598_v12 = vpack.c.bf16 (!%p237_p2), %v278_v5, %v277_v2  ;;  %v365_v14 = vld [vmem:[%s755_s3 + $0x20] sm:$0xff] (!%p237_p2)  ;;  %vm376_vm2 = vcmask (!%p237_p2), 523264  }
   0x8   : > { %596 = vmatpush3.bf16.msra.mxu0 (!%p237_p2), %v595_v4  ;;  %v604_v13 = vpack.c.bf16 (!%p237_p2), %v364_v11, %v363_v10  ;;  %v366_v15 = vld [vmem:[%s755_s3 + $0x28] sm:$0xff] (!%p237_p2)  ;;  %v367_v18 = vld [vmem:[%s755_s3 + $0x30] sm:$0xff] (!%p237_p2)  ;;  %v368_v19 = vld [vmem:[%s755_s3 + $0x38] sm:$0xff] (!%p237_p2) }
   0x9   : > { %597 = vmatprep.subr.bf16.mxu0 (!%p237_p2), %v633_v3  ;;  %602 = vmatpush3.bf16.msra.mxu1 (!%p237_p2), %v601_v9  ;;  %v607_v17 = vpack.c.bf16 (!%p237_p2), %v366_v15, %v365_v14  ;;  %v610_v20 = vpack.c.bf16 (!%p237_p2), %v368_v19, %v367_v18  ;;  %v542_v21 = vld [vmem:[%s754_s2] ss:$0 sm:$0xff] (!%p237_p2) }
   0xa   : > { %603 = vmatprep.subr.bf16.mxu1 (!%p237_p2), %v633_v3  ;;  %v544_v26 = vld [vmem:[%s756_s4] ss:$0 sm:$0xff] (!%p237_p2) }
   0xb   : > { %v546_v41 = vld [vmem:[%s757_s5] ss:$0 sm:$0xff] (!%p237_p2) }
   0xc   : > { %599 = vmatpush3.bf16.msra.mxu0 (!%p237_p2), %v598_v12  ;;  %v547_v43 = vld [vmem:[%s758_s6] ss:$0 sm:$0xff] (!%p237_p2) }
   0xd   : > { %s761_s25 = smov (!%p266_p3, %s535_s25), 1  ;;  %605 = vmatpush3.bf16.msra.mxu1 %v604_v13 }
   0xe   : > { %s540_s19 = sshll.u32 %s761_s25, 3  ;;  %606 = vmatprep.subr.bf16.mxu1 %v633_v3 }
   0xf   : > { %s269_s28 = scalar_lea.vmem %s752_s0, %s540_s19  ;;  %s273_s21 = scalar_lea.vmem %s759_s7, %s540_s19 }
  0x10   : > { %v274_v16 = vld [vmem:[%s269_s28] sm:$0xff] }
  0x11   : > { %573 = vmatmul.mubr.msk.f32.vlgmr.msra.gmra.mrb[0].mxu0 %vm286_vm1, %v274_v16  ;;  %608 = vmatpush3.bf16.msra.mxu1 %v607_v17 }
  0x12   : > { %609 = vmatprep.subr.bf16.mxu1 %v633_v3 }
  0x15   : > { %611 = vmatpush3.bf16.msra.mxu1 %v610_v20 }
  0xe4   : > { %v356_v22 = vpop.f32.mrb[0].mxu0 }
  0xe5   : > { %v357_v23 = vadd.f32 %v542_v21, %v356_v22  ;;  %v574_v24 = vpop.f32.mrb[1].mxu0 }
  0xe7   : > { %v360_v25 = vmax.f32 %v357_v23, 0.0 }
  0xe9   : > { %592 = vmatmul.mubr.msk.f32.vlgmr.msra.gmra.mrb[0].mxu1 %vm376_vm2, %v360_v25 }
 0x1bc   : > { %v446_v27 = vpop.f32.mrb[0].mxu1 }
 0x1bd   : > { %v447_v28 = vadd.f32 %v544_v26, %v446_v27  ;;  %v593_v29 = vpop.f32.mrb[1].mxu1 }
 0x1bf   : > { %v450_v30 = vadd.f32 %v447_v28, %v274_v16 }
 0x1c1   : > { %v451_v31 = vsel %vm286_vm1, %v450_v30, 0.0 }
 0x1c2   : > { %452 = vadd.xlane.f32.xlu0 %v451_v31 }
 0x24f   : > { %v453_v32 = vpop.xlane.xlu0 %452 }
 0x250   : > { %v455_v33 = vmul.f32 0.03125, %v453_v32 }
 0x252   : > { %v456_v34 = vsub.f32 %v450_v30, %v455_v33 }
 0x254   : > { %v457_v35 = vmul.f32 %v456_v34, %v456_v34 }
 0x256   : > { %v458_v36 = vsel %vm286_vm1, %v457_v35, 0.0 }
 0x257   : > { %459 = vadd.xlane.f32.xlu0 %v458_v36 }
 0x2e4   : > { %v460_v37 = vpop.xlane.xlu0 %459 }
 0x2e5   : > { %v461_v38 = vmul.f32 0.03125, %v460_v37 }
 0x2e7   : > { %v462_v39 = vadd.f32 1e-05, %v461_v38 }
 0x2e9   : > { %623 = vrsqrt.f32 %v462_v39 }
 0x2f3   : > { %v624_v40 = vpop.eup %623 }
 0x2f4   : > { %v464_v42 = vmul.f32 %v624_v40, %v456_v34 }
 0x2f6   : > { %v472_v44 = vmul.f32 %v546_v41, %v464_v42 }
 0x2f8   : > { %v480_v45 = vadd.f32 %v547_v43, %v472_v44 }
 0x2fa   : > { %481 = vst.msk [vmem:[%s273_s21] sm:$0xff] %vm286_vm1, %v480_v45 }
 0x2fb PF: > { %s17_s24 = sadd.s32 1, %s631_s24  }
 0x2fc   : > { %p14_p4 = scmp.ge.s32.totalorder %s17_s24, 4  }
 0x2fe   :  { %16 = sbr.rel (!%p14_p4) target bundleno = 1 (0x1), region = 78 }

// kernel: transformer_decoder_forward.31
= control target key start
LH: loop header
LB: loop body
LE: loop exit
PB: predicated region body
PF: predicated region fallthrough
CT: control target
= control target key end

     0   :  { %12 = vsyncpa [#allocation3], 0  ;;  %s937_s0 = inlined_call_operand.vmem [shape: f32[16,32], index: 0, kind: input, shape index: {}]   ;;  %s938_s1 = inlined_call_operand.vmem [shape: f32[32,64], index: 1, kind: input, shape index: {}]   ;;  %s939_s2 = inlined_call_operand.vmem [shape: f32[1,64], index: 2, kind: input, shape index: {}]   ;;  %s940_s3 = inlined_call_operand.vmem [shape: f32[64,32], index: 3, kind: input, shape index: {}]   ;;  %s941_s4 = inlined_call_operand.vmem [shape: f32[1,32], index: 4, kind: input, shape index: {}]   ;;  %s942_s5 = inlined_call_operand.vmem [shape: f32[1,32], index: 5, kind: input, shape index: {}]   ;;  %s943_s6 = inlined_call_operand.vmem [shape: f32[1,32], index: 6, kind: input, shape index: {}]   ;;  %s944_s7 = inlined_call_operand.hbm [shape: f32[16,32], index: 7, kind: output, shape index: {}]  }
   0x1   :  { %14 = vsyncpa [#allocation3 + $0x1], 0  ;;  %s785_s24 = smov 0   ;;  %s787_s25 = smov 0  }
   0x2   :  { %s789_s26 = smov 0   ;;  %s791_s27 = smov 0  }
   0x3 LB: > { %s806_s28 = sadd.s32 4294967295, %s739_s27   ;;  %s555_s29 = sadd.s32 4294967294, %s739_s27   ;;  %s739_s27 = sphi %s791_s27, %s950_s27   ;;  %s735_s26 = sphi %s789_s26, %s949_s26   ;;  %s731_s25 = sphi %s787_s25, %s948_s25   ;;  %s727_s24 = sphi %s785_s24, %s947_s24  }
   0x4   : > { %s810_s30 = sadd.s32 1, %s739_s27   ;;  %s179_s8 = sadd.s32 1, %s735_s26 }
   0x5   : > { %s176_s9 = ssub.s32 %s739_s27, %s810_s30  ;;  %p189_p0 = scmp.ne.s32.totalorder %s735_s26, %s731_s25 }
   0x6   : > { %p177_p1 = scmp.eq.s32.totalorder %s176_s9, 0  ;;  %p190_p2 = scmp.eq.s32.totalorder %s806_s28, 1 }
   0x7   : > { %p195_p3 = scmp.ne.s32.totalorder %s731_s25, %s727_s24  ;;  %p196_p4 = scmp.eq.s32.totalorder %s555_s29, 1 }
   0x8   : > { %s821_s10 = scalar_select %p177_p1, %s735_s26, %s179_s8  }
   0x9   : > { %p823_p5 = por %p190_p2, %p189_p0  ;;  %p827_p6 = por %p196_p4, %p195_p3 }
   0xa   : > { %p558_p7 = scmp.ge.s32.totalorder %s739_s27, 1  ;;  %p239_p8 = scmp.lt.s32.totalorder %s739_s27, 3 }
   0xc   : > { %p240_p9 = pnand %p558_p7, %p239_p8 }
   0xd   : > { %v275_v0 = vld [vmem:[%s938_s1] sm:$0xff] (!%p240_p9)  ;;  %v276_v1 = vld [vmem:[%s938_s1 + $0x8] sm:$0xff] (!%p240_p9)  ;;  %v277_v2 = vld [vmem:[%s938_s1 + $0x10] sm:$0xff] (!%p240_p9)  ;;  %v741_v3 = vmov (!%p240_p9), 0.0|0.0   ;;  %vm742_vm0 = vmmov (!%p240_p9), 0   ;;  %v743_v6 = vmov (!%p240_p9), 0.0  }
   0xe   : > { %243 = sbr.rel (%p240_p9) target bundleno = 785 (0x311), region = 48  ;;  %615 = vmatprep.subr.bf16.mxu0 (!%p240_p9), %v741_v3  ;;  %v616_v4 = vpack.c.bf16 (!%p240_p9), %v276_v1, %v275_v0  ;;  %v278_v5 = vld [vmem:[%s938_s1 + $0x18] sm:$0xff] (!%p240_p9)  ;;  %593 = vmatprep.mubr.msk.f32.mxu0 (!%p240_p9), %vm742_vm0, %v743_v6  ;;  %p270_p10 = scmp.lt.s32.totalorder (!%p240_p9), %s806_s28, 1  ;;  %v361_v7 = vld [vmem:[%s940_s3] sm:$0xff] (!%p240_p9)  ;;  %v362_v8 = vld [vmem:[%s940_s3 + $0x8] sm:$0xff] (!%p240_p9)  ;;  %vm286_vm1 = vcmask (!%p240_p9), 261120  }
   0xf   : > { %621 = vmatprep.subr.bf16.mxu1 (!%p240_p9), %v741_v3  ;;  %v622_v9 = vpack.c.bf16 (!%p240_p9), %v362_v8, %v361_v7  ;;  %v363_v10 = vld [vmem:[%s940_s3 + $0x10] sm:$0xff] (!%p240_p9)  ;;  %v364_v11 = vld [vmem:[%s940_s3 + $0x18] sm:$0xff] (!%p240_p9)  ;;  %612 = vmatprep.mubr.msk.f32.mxu1 (!%p240_p9), %vm742_vm0, %v743_v6  ;;  %v619_v12 = vpack.c.bf16 (!%p240_p9), %v278_v5, %v277_v2  ;;  %v365_v14 = vld [vmem:[%s940_s3 + $0x20] sm:$0xff] (!%p240_p9)  ;;  %vm376_vm2 = vcmask (!%p240_p9), 523264   ;;  %s267_s18 = sand.u32 (!%p240_p9), 1, %s731_s25   ;;  %s568_s29 = sshll.u32 (!%p240_p9), %s806_s28, 7 }
  0x10   : > { %617 = vmatpush3.bf16.msra.mxu0 (!%p240_p9), %v616_v4  ;;  %v625_v13 = vpack.c.bf16 (!%p240_p9), %v364_v11, %v363_v10  ;;  %v366_v15 = vld [vmem:[%s940_s3 + $0x28] sm:$0xff] (!%p240_p9)  ;;  %v367_v18 = vld [vmem:[%s940_s3 + $0x30] sm:$0xff] (!%p240_p9)  ;;  %v368_v19 = vld [vmem:[%s940_s3 + $0x38] sm:$0xff] (!%p240_p9)  ;;  %s559_s19 = sshll.u32 (!%p240_p9), %s267_s18, 3 }
  0x11   : > { %618 = vmatprep.subr.bf16.mxu0 (!%p240_p9), %v741_v3  ;;  %623 = vmatpush3.bf16.msra.mxu1 (!%p240_p9), %v622_v9  ;;  %v628_v17 = vpack.c.bf16 (!%p240_p9), %v366_v15, %v365_v14  ;;  %v631_v20 = vpack.c.bf16 (!%p240_p9), %v368_v19, %v367_v18  ;;  %v561_v21 = vld [vmem:[%s939_s2] ss:$0 sm:$0xff] (!%p240_p9)  ;;  %s269_s8 = scalar_lea.vmem (!%p240_p9), [#allocation2], %s559_s19 }
  0x12   : > { %624 = vmatprep.subr.bf16.mxu1 (!%p240_p9), %v741_v3  ;;  %v563_v26 = vld [vmem:[%s941_s4] ss:$0 sm:$0xff] (!%p240_p9)  ;;  %s496_s9 = sshll.u32 (!%p240_p9), %s269_s8, 4  ;;  %s896_s9 = int_to_ptr.vmem [resolvable:$true] %s496_s9 }
  0x13   : > { %v565_v41 = vld [vmem:[%s942_s5] ss:$0 sm:$0xff] (!%p240_p9)  ;;  %s677_s17 = scalar_lea.vmem (!%p240_p9), %s896_s9, 128 }
  0x14   : > { %620 = vmatpush3.bf16.msra.mxu0 (!%p240_p9), %v619_v12  ;;  %v566_v43 = vld [vmem:[%s943_s6] ss:$0 sm:$0xff] (!%p240_p9)  ;;  %p678_p11 = scmp.ne.s32.totalorder (!%p240_p9), %s896_s9, %s677_s17 }
  0x15   : > { %s271_s15 = scalar_select %p270_p10, %s806_s28, 1  ;;  %626 = vmatpush3.bf16.msra.mxu1 %v625_v13 }
  0x16   : > { %627 = vmatprep.subr.bf16.mxu1 %v741_v3  ;;  %p679_p12 = pnand %p678_p11, %p823_p5  ;;  %s744_s28 = smov [#allocation2]  }
  0x17   : > { %s560_s16 = sshll.u32 %s271_s15, 3  ;;  %s894_s15 = scalar_lea.hbm %s944_s7, %s568_s29 }
  0x18   : > { %s273_s23 = scalar_lea.vmem %s937_s0, %s560_s16  ;;  %s483_s16 = scalar_lea.sflag [#allocation3], %s267_s18 }
  0x19   : > { %v274_v16 = vld [vmem:[%s273_s23] sm:$0xff]  ;;  %629 = vmatpush3.bf16.msra.mxu1 %v628_v17  ;;  %p680_p13 = pneg %p679_p12  ;;  %s681_s19 = sshll.u32 %s744_s28, 4  ;;  %s682_s19 = int_to_ptr.vmem [resolvable:$false] %s681_s19 }
  0x1a   : > { %594 = vmatmul.mubr.msk.f32.vlgmr.msra.gmra.mrb[0].mxu0 %vm286_vm1, %v274_v16  ;;  %630 = vmatprep.subr.bf16.mxu1 %v741_v3  ;;  %s683_s20 = scalar_lea.vmem %s682_s19, 256  ;;  %p684_p0 = scmp.lt.s32.totalorder %s896_s9, %s682_s19 }
  0x1b   : > { %p685_p1 = scmp.lt.s32.totalorder %s683_s20, %s677_s17 }
  0x1d   : > { %632 = vmatpush3.bf16.msra.mxu1 %v631_v20  ;;  %p686_p2 = por %p685_p1, %p684_p0 }
  0x1f   : > { %p687_p3 = pnand %p686_p2, %p680_p13 }
  0xed   : > { %v356_v22 = vpop.f32.mrb[0].mxu0 }
  0xee   : > { %v357_v23 = vadd.f32 %v561_v21, %v356_v22  ;;  %v595_v24 = vpop.f32.mrb[1].mxu0 }
  0xf0   : > { %v360_v25 = vmax.f32 %v357_v23, 0.0 }
  0xf2   : > { %613 = vmatmul.mubr.msk.f32.vlgmr.msra.gmra.mrb[0].mxu1 %vm376_vm2, %v360_v25 }
 0x1c5   : > { %v446_v27 = vpop.f32.mrb[0].mxu1 }
 0x1c6   : > { %v447_v28 = vadd.f32 %v563_v26, %v446_v27  ;;  %v614_v29 = vpop.f32.mrb[1].mxu1 }
 0x1c8   : > { %v450_v30 = vadd.f32 %v447_v28, %v274_v16 }
 0x1ca   : > { %v451_v31 = vsel %vm286_vm1, %v450_v30, 0.0 }
 0x1cb   : > { %452 = vadd.xlane.f32.xlu0 %v451_v31 }
 0x258   : > { %v453_v32 = vpop.xlane.xlu0 %452 }
 0x259   : > { %v455_v33 = vmul.f32 0.03125, %v453_v32 }
 0x25b   : > { %v456_v34 = vsub.f32 %v450_v30, %v455_v33 }
 0x25d   : > { %v457_v35 = vmul.f32 %v456_v34, %v456_v34 }
 0x25f   : > { %v458_v36 = vsel %vm286_vm1, %v457_v35, 0.0 }
 0x260   : > { %459 = vadd.xlane.f32.xlu0 %v458_v36 }
 0x2ed   : > { %v460_v37 = vpop.xlane.xlu0 %459 }
 0x2ee   : > { %v461_v38 = vmul.f32 0.03125, %v460_v37 }
 0x2f0   : > { %v462_v39 = vadd.f32 1e-05, %v461_v38 }
 0x2f2   : > { %675 = vrsqrt.f32 %v462_v39 }
 0x2fc   : > { %v676_v40 = vpop.eup %675 }
 0x2fd   : > { %v464_v42 = vmul.f32 %v676_v40, %v456_v34 }
 0x2ff   : > { %v472_v44 = vmul.f32 %v565_v41, %v464_v42 }
 0x301   : > { %v480_v45 = vadd.f32 %v566_v43, %v472_v44 }
 0x303   : > { %481 = vst.msk [vmem:[%s269_s8] sm:$0xff] %vm286_vm1, %v480_v45 }
 0x304   : > { %690 = shalt.err (!%p687_p3)
}
 0x305   : > { %s691_s18 = scalar_lea.hbm %s894_s15, 128  ;;  %s695_s23 = scalar_lea.hbm %s944_s7, 256 }
 0x306   : > { %p692_p4 = scmp.ne.s32.totalorder %s894_s15, %s691_s18  ;;  %p696_p9 = scmp.lt.u32.totalorder %s894_s15, %s944_s7 }
 0x307   : > { %p697_p10 = scmp.lt.u32.totalorder %s695_s23, %s691_s18  ;;  %p699_p12 = scmp.lt.u32.totalorder %s691_s18, %s894_s15 }
 0x308   : > { %p693_p7 = pnand %p692_p4, %p823_p5 }
 0x309   : > { %p698_p11 = por %p697_p10, %p696_p9 }
 0x30a   : > { %p694_p8 = pneg %p693_p7 }
 0x30b   : > { %p700_p13 = por %p699_p12, %p698_p11 }
 0x30d   : > { %p701_p0 = pnand %p700_p13, %p694_p8 }
 0x30f   : > { %704 = shalt.err (!%p701_p0)
}
 0x310   : > { %633 = dma.vmem_to_hbm [thread:$0]  (%p823_p5), %s896_s9, 128, %s894_s15, %s483_s16  }
 0x311 PF: > { %p639_p1 = scmp.ge.s32.totalorder %s739_s27, 2  ;;  %s508_s13 = sand.u32 1, %s727_s24  }
 0x312   : > { %s509_s14 = scalar_lea.sflag [#allocation3], %s508_s13 }
 0x313   : > { %p636_p2 = pnand %p639_p1, %p827_p6 }
 0x315   : > { %722 = dma.done.wait (!%p636_p2), %s509_s14, 128  }
 0x316   : > { %724 = vsyncadd (!%p636_p2), %s509_s14, 4294967168  ;;  %p17_p3 = scmp.ge.s32.totalorder %s810_s30, 4   ;;  %s947_s24 = smov %s731_s25 }
 0x317   : > { %s948_s25 = smov %s735_s26  ;;  %s949_s26 = smov %s821_s10 }
 0x318   : > { %s950_s27 = smov %s810_s30  ;;  %19 = sbr.rel (!%p17_p3) target bundleno = 3 (0x3), region = 83 }
 0x31f   :  { %514 = vsyncpa [#allocation3], 1 }
 0x320   :  { %516 = vsyncpa [#allocation3 + $0x1], 1 }

// kernel: transformer_decoder_forward.21
= control target key start
LH: loop header
LB: loop body
LE: loop exit
PB: predicated region body
PF: predicated region fallthrough
CT: control target
= control target key end

     0   :  { %s1176_s15 = smov 0   ;;  %s1285_s0 = inlined_call_operand.vmem [shape: f32[2,8,32], index: 0, kind: input, shape index: {}]   ;;  %s1286_s1 = inlined_call_operand.vmem [shape: f32[2,8,32], index: 1, kind: input, shape index: {}]   ;;  %s1287_s2 = inlined_call_operand.vmem [shape: f32[2,8,32], index: 2, kind: input, shape index: {}]   ;;  %s1288_s3 = inlined_call_operand.vmem [shape: f32[2,1,8], index: 3, kind: input, shape index: {}]   ;;  %s1289_s4 = inlined_call_operand.vmem [shape: f32[2,8,32], index: 4, kind: output, shape index: {}]  }
   0x1 LB: > { %s1022_s16 = sadd.s32 4294967295, %s1140_s15   ;;  %p1026_p0 = scmp.ge.s32.totalorder %s1140_s15, 1  ;;  %s1140_s15 = sphi %s1176_s15, %s14_s15  }
   0x2   : > { %p187_p1 = scmp.lt.s32.totalorder %s1140_s15, 3 }
   0x4   : > { %p188_p2 = pnand %p1026_p0, %p187_p1 }
   0x5   : > { %p222_p3 = scmp.lt.s32.totalorder (!%p188_p2), %s1022_s16, 1  ;;  %v1142_v0 = vmov (!%p188_p2), 0.0   ;;  %vm1143_vm0 = vmmov (!%p188_p2), 0   ;;  %vm245_vm1 = vcmask (!%p188_p2), 64512   ;;  %v325_v3 = vlaneseq (!%p188_p2)  ;;  %s1145_s27 = smov (!%p188_p2), 120  }
   0x6   : > { %191 = sbr.rel (%p188_p2) target bundleno = 1463 (0x5b7), region = 36  ;;  %1061 = vmatprep.subr.mxu0 (!%p188_p2), %v1142_v0  ;;  %1063 = vmatprep.mubr.msk.f32.mxu0 (!%p188_p2), %vm1143_vm0, %v1142_v0  ;;  %v1144_v7 = vmov (!%p188_p2), 0   ;;  %s1146_s28 = smov (!%p188_p2), 112   ;;  %vm588_vm4 = vcmask (!%p188_p2), 130112   ;;  %vm761_vm5 = vcmask (!%p188_p2), 195712   ;;  %vm934_vm6 = vcmask (!%p188_p2), 261312  }
   0x7   : > { %1066 = vmatprep.subr.mxu1 (!%p188_p2), %v1142_v0  ;;  %1068 = vmatprep.mubr.msk.f32.mxu1 (!%p188_p2), %vm1143_vm0, %v1142_v0  ;;  %v326_v5 = vshrl.u32 (!%p188_p2), %v325_v3, 7  ;;  %s1147_s29 = smov (!%p188_p2), 104   ;;  %s1148_s10 = smov (!%p188_p2), 8  }
   0x8   : > { %s1149_s11 = smov (!%p188_p2), 16   ;;  %s1150_s12 = smov (!%p188_p2), 24  }
   0x9   : > { %v327_v6 = vsub.s32 (!%p188_p2), 0, %v326_v5 }
   0xd   : > { %s1291_s16 = smov (!%p222_p3, %s1022_s16), 1 }
   0xe   : > { %s1190_s17 = sshll.u32 %s1291_s16, 3  ;;  %s236_s26 = scalar_lea.vmem %s1288_s3, %s1291_s16 }
   0xf   : > { %s229_s20 = scalar_lea.vmem %s1286_s1, %s1190_s17  ;;  %s225_s23 = scalar_lea.vmem %s1285_s0, %s1190_s17  ;;  %v241_v4 = vld [vmem:[%s236_s26] sm:$0x1] }
  0x10   : > { %v243_v1 = vld [vmem:[%s229_s20] sm:$0xff]  ;;  %vm323_vm2 = vcmp.gt.f32.partialorder %v241_v4, 0.0  ;;  %s233_s6 = scalar_lea.vmem %s1287_s2, %s1190_s17  ;;  %s1248_s9 = scalar_lea.vmem %s1289_s4, %s1190_s17 }
  0x11   : > { %1062 = vmatpush3.xpose.msk.msra.mxu0 %vm245_vm1, %v243_v1  ;;  %v242_v2 = vld [vmem:[%s225_s23] sm:$0xff]  ;;  %v324_v8 = vsel %vm323_vm2, 1, %v1144_v7  ;;  %418 = vrot.lane.b32.xlu1 %v243_v1, %s1145_s27 }
  0x12   : > { %1076 = vmatprep.subr.mxu0 %v1142_v0  ;;  %v1208_v9 = vrot.slane %v324_v8, %v327_v6  ;;  %v1224_v20 = vld [vmem:[%s233_s6] sm:$0xff] }
  0x13   : > { %1067 = vmatpush3.msra.mxu1 %v1224_v20 }
  0x14   : > { %1064 = vmatmul.mubr.msk.f32.vlgmr.msra.gmra.mrb[0].mxu0 %vm245_vm1, %v242_v2  ;;  %vm329_vm3 = vcmp.eq.s32.totalorder %v1208_v9, 1  ;;  %1071 = vmatprep.subr.mxu1 %v1142_v0 }
  0x15   : > { %1078 = vmatprep.mubr.msk.f32.mxu0 %vm1143_vm0, %v1142_v0  ;;  %416 = vrot.lane.b32.xlu1 %v242_v2, %s1145_s27 }
  0x19   : > { %590 = vrot.lane.b32.xlu1 %v242_v2, %s1146_s28 }
  0x1d   : > { %765 = vrot.lane.b32.xlu1 %v243_v1, %s1147_s29 }
  0x21   : > { %763 = vrot.lane.b32.xlu1 %v242_v2, %s1147_s29 }
  0x83   : > { %v419_v21 = vpop.permute.xlu1 %418 }
  0x87   : > { %v417_v23 = vpop.permute.xlu1 %416 }
  0x8b   : > { %v591_v25 = vpop.permute.xlu1 %590 }
  0x8f   : > { %v766_v28 = vpop.permute.xlu1 %765 }
  0x93   : > { %v764_v29 = vpop.permute.xlu1 %763 }
  0xe7   : > { %v318_v10 = vpop.f32.mrb[0].mxu0 }
  0xe8   : > { %v322_v11 = vmul.f32 0.35355338, %v318_v10  ;;  %v1065_v12 = vpop.f32.mrb[1].mxu0 }
  0xea   : > { %v330_v13 = vsel %vm329_vm3, %v322_v11, -1e+09 }
  0xeb   : > { %v331_v14 = vsel %vm245_vm1, %v330_v13, -inf }
  0xec   : > { %332 = vmax.xlane.f32.xlu0 %v331_v14 }
 0x179   : > { %v333_v15 = vpop.xlane.xlu0 %332 }
 0x17a   : > { %v334_v16 = vsub.f32 %v330_v13, %v333_v15 }
 0x17c   : > { %v335_v17 = vmul.f32 1.442695, %v334_v16 }
 0x17e   : > { %1118 = vpow2.f32 %v335_v17 }
 0x188   : > { %v1119_v18 = vpop.eup %1118 }
 0x189   : > { %v337_v19 = vsel %vm245_vm1, %v1119_v18, 0.0 }
 0x18a   : > { %338 = vadd.xlane.f32.xlu0 %v337_v19 }
 0x1a0   : > { %592 = vrot.lane.b32.xlu0 %v243_v1, %s1146_s28 }
 0x217   : > { %v339_v22 = vpop.xlane.xlu0 %338 }
 0x218   : > { %1120 = vrcp.f32 %v339_v22 }
 0x21b   : > { %v593_v27 = vpop.permute.xlu0 %592 }
 0x222   : > { %v1121_v24 = vpop.eup %1120 }
 0x223   : > { %v341_v26 = vmul.f32 %v1121_v24, %v1119_v18 }
 0x225   : > { %1069 = vmatmul.mubr.msk.f32.vlgmr.msra.gmra.mrb[0].mxu1 %vm245_vm1, %v341_v26 }
 0x226   : > { %1072 = vmatpush3.xpose.msk.msra.mxu1 %vm245_vm1, %v419_v21  ;;  %1073 = vmatprep.mubr.msk.f32.mxu1 %vm1143_vm0, %v1142_v0 }
 0x227   : > { %1081 = vmatprep.subr.mxu1 %v1142_v0 }
 0x229   : > { %1074 = vmatmul.mubr.msk.f32.vlgmr.msra.gmra.mrb[2].mxu1 %vm245_vm1, %v417_v23 }
 0x22a   : > { %1082 = vmatpush3.xpose.msk.msra.mxu1 %vm245_vm1, %v593_v27  ;;  %1083 = vmatprep.mubr.msk.f32.mxu1 %vm1143_vm0, %v1142_v0 }
 0x22b   : > { %1091 = vmatprep.subr.mxu1 %v1142_v0 }
 0x22d   : > { %1084 = vmatmul.mubr.msk.f32.vlgmr.msra.gmra.mrb[4].mxu1 %vm245_vm1, %v591_v25 }
 0x22e   : > { %1092 = vmatpush3.xpose.msk.msra.mxu1 %vm245_vm1, %v766_v28  ;;  %1093 = vmatprep.mubr.msk.f32.mxu1 %vm1143_vm0, %v1142_v0 }
 0x231   : > { %1094 = vmatmul.mubr.msk.f32.vlgmr.msra.gmra.mrb[6].mxu1 %vm245_vm1, %v764_v29 }
 0x2f8   : > { %v411_v30 = vpop.f32.mrb[0].mxu1 }
 0x2f9   : > { %415 = vst.msk [vmem:[%s1248_s9] sm:$0xff] %vm245_vm1, %v411_v30  ;;  %v1070_v31 = vpop.f32.mrb[1].mxu1 }
 0x2fc   : > { %v490_v32 = vpop.f32.mrb[2].mxu1 }
 0x2fd   : > { %v494_v33 = vmul.f32 0.35355338, %v490_v32  ;;  %v1075_v34 = vpop.f32.mrb[3].mxu1 }
 0x2ff   : > { %v495_v35 = vsel %vm329_vm3, %v494_v33, -1e+09 }
 0x300   : > { %v664_v36 = vpop.f32.mrb[4].mxu1  ;;  %v496_v37 = vsel %vm245_vm1, %v495_v35, -inf }
 0x301   : > { %v668_v38 = vmul.f32 0.35355338, %v664_v36  ;;  %497 = vmax.xlane.f32.xlu1 %v496_v37  ;;  %v1085_v39 = vpop.f32.mrb[5].mxu1 }
 0x303   : > { %v669_v40 = vsel %vm329_vm3, %v668_v38, -1e+09 }
 0x304   : > { %v837_v41 = vpop.f32.mrb[6].mxu1  ;;  %v670_v42 = vsel %vm245_vm1, %v669_v40, -inf }
 0x305   : > { %v841_v43 = vmul.f32 0.35355338, %v837_v41  ;;  %671 = vmax.xlane.f32.xlu0 %v670_v42  ;;  %v1095_v44 = vpop.f32.mrb[7].mxu1 }
 0x307   : > { %v842_v45 = vsel %vm329_vm3, %v841_v43, -1e+09 }
 0x308   : > { %v843_v46 = vsel %vm245_vm1, %v842_v45, -inf }
 0x309   : > { %844 = vmax.xlane.f32.xlu1 %v843_v46 }
 0x38e   : > { %v498_v47 = vpop.xlane.xlu1 %497 }
 0x38f   : > { %v499_v48 = vsub.f32 %v495_v35, %v498_v47 }
 0x391   : > { %v500_v49 = vmul.f32 1.442695, %v499_v48 }
 0x392   : > { %v672_v50 = vpop.xlane.xlu0 %671 }
 0x393   : > { %1122 = vpow2.f32 %v500_v49  ;;  %v673_v51 = vsub.f32 %v669_v40, %v672_v50 }
 0x395   : > { %v674_v52 = vmul.f32 1.442695, %v673_v51 }
 0x396   : > { %v845_v57 = vpop.xlane.xlu1 %844 }
 0x397   : > { %1124 = vpow2.f32 %v674_v52  ;;  %v846_v58 = vsub.f32 %v842_v45, %v845_v57 }
 0x399   : > { %v847_v59 = vmul.f32 1.442695, %v846_v58 }
 0x39b   : > { %1126 = vpow2.f32 %v847_v59 }
 0x39d   : > { %v1123_v53 = vpop.eup %1122 }
 0x39e   : > { %v502_v54 = vsel %vm245_vm1, %v1123_v53, 0.0 }
 0x39f   : > { %503 = vadd.xlane.f32.xlu1 %v502_v54 }
 0x3a1   : > { %v1125_v55 = vpop.eup %1124 }
 0x3a2   : > { %v676_v56 = vsel %vm245_vm1, %v1125_v55, 0.0 }
 0x3a3   : > { %677 = vadd.xlane.f32.xlu0 %v676_v56 }
 0x3a5   : > { %v1127_v60 = vpop.eup %1126 }
 0x3a6   : > { %v849_v61 = vsel %vm245_vm1, %v1127_v60, 0.0 }
 0x3b0   : > { %681 = vrot.lane.b32.xlu1 %v1224_v20, %s1146_s28 }
 0x3b9   : > { %508 = vrot.lane.b32.xlu0 %v1224_v20, %s1145_s27 }
 0x3d4   : > { %850 = vadd.xlane.f32.xlu1 %v849_v61 }
 0x3e5   : > { %854 = vrot.lane.b32.xlu1 %v1224_v20, %s1147_s29 }
 0x42c   : > { %v504_v62 = vpop.xlane.xlu1 %503 }
 0x42d   : > { %1128 = vrcp.f32 %v504_v62 }
 0x430   : > { %v678_v63 = vpop.xlane.xlu0 %677  ;;  %v682_v4 = vpop.permute.xlu1 %681 }
 0x431   : > { %1130 = vrcp.f32 %v678_v63 }
 0x434   : > { %v509_v1 = vpop.permute.xlu0 %508 }
 0x435   : > { %1077 = vmatpush3.msra.mxu0 %v509_v1 }
 0x436   : > { %1086 = vmatprep.subr.mxu0 %v1142_v0 }
 0x437   : > { %v1129_v2 = vpop.eup %1128 }
 0x438   : > { %v506_v3 = vmul.f32 %v1129_v2, %v1123_v53 }
 0x43a   : > { %1079 = vmatmul.mubr.msk.f32.vlgmr.msra.gmra.mrb[2].mxu0 %vm245_vm1, %v506_v3 }
 0x43b   : > { %v1131_v5 = vpop.eup %1130  ;;  %1087 = vmatpush3.msra.mxu0 %v682_v4  ;;  %1088 = vmatprep.mubr.msk.f32.mxu0 %vm1143_vm0, %v1142_v0 }
 0x43c   : > { %v680_v6 = vmul.f32 %v1131_v5, %v1125_v55  ;;  %1096 = vmatprep.subr.mxu0 %v1142_v0 }
 0x43e   : > { %1089 = vmatmul.mubr.msk.f32.vlgmr.msra.gmra.mrb[4].mxu0 %vm245_vm1, %v680_v6 }
 0x43f   : > { %1098 = vmatprep.mubr.msk.f32.mxu0 %vm1143_vm0, %v1142_v0 }
 0x461   : > { %v851_v7 = vpop.xlane.xlu1 %850 }
 0x462   : > { %1132 = vrcp.f32 %v851_v7 }
 0x465   : > { %v855_v8 = vpop.permute.xlu1 %854 }
 0x466   : > { %1097 = vmatpush3.msra.mxu0 %v855_v8 }
 0x46c   : > { %v1133_v9 = vpop.eup %1132 }
 0x46d   : > { %v853_v10 = vmul.f32 %v1133_v9, %v1127_v60 }
 0x46f   : > { %1099 = vmatmul.mubr.msk.f32.vlgmr.msra.gmra.mrb[6].mxu0 %vm245_vm1, %v853_v10 }
 0x50d   : > { %v580_v11 = vpop.f32.mrb[2].mxu0 }
 0x50e   : > { %585 = vrot.lane.b32.xlu0 %v580_v11, %s1148_s10  ;;  %v1080_v12 = vpop.f32.mrb[3].mxu0 }
 0x511   : > { %v753_v13 = vpop.f32.mrb[4].mxu0 }
 0x512   : > { %758 = vrot.lane.b32.xlu1 %v753_v13, %s1149_s11  ;;  %v1090_v14 = vpop.f32.mrb[5].mxu0 }
 0x542   : > { %v926_v0 = vpop.f32.mrb[6].mxu0 }
 0x543   : > { %931 = vrot.lane.b32.xlu0 %v926_v0, %s1150_s12  ;;  %v1100_v15 = vpop.f32.mrb[7].mxu0 }
 0x580   : > { %v586_v16 = vpop.permute.xlu0 %585 }
 0x581   : > { %589 = vst.msk [vmem:[%s1248_s9] sm:$0xff] %vm588_vm4, %v586_v16 }
 0x584   : > { %v759_v17 = vpop.permute.xlu1 %758 }
 0x585   : > { %762 = vst.msk [vmem:[%s1248_s9] sm:$0xff] %vm761_vm5, %v759_v17 }
 0x5b5   : > { %v932_v18 = vpop.permute.xlu0 %931 }
 0x5b6   : > { %935 = vst.msk [vmem:[%s1248_s9] sm:$0xff] %vm934_vm6, %v932_v18 }
 0x5b7 PF: > { %s14_s15 = sadd.s32 1, %s1140_s15  }
 0x5b8   : > { %p11_p4 = scmp.ge.s32.totalorder %s14_s15, 4  }
 0x5ba   :  { %13 = sbr.rel (!%p11_p4) target bundleno = 1 (0x1), region = 75 }

</bundles_post_ra>
